<compile_context>
chip_gen: v5e
topology: v5e:2x2
jax: 0.10.0
libtpu: 0.0.40
codegen_flags: <defaults>
</compile_context>

<pallas_src>
import numpy as np
import jax
import jax.numpy as jnp
from jax.experimental import pallas as pl
from jax.experimental.pallas import tpu as pltpu

_Z_TWO_THIRDS = 0.4307272992954576   # scipy.stats.norm.ppf(2/3); ppf(1/3) = -this
_BN_MOMENTUM = 0.1                   # nn.BatchNorm1d default


def lng_curriculum_kernel(tp_ref, loss_ref, lng_ref, conf_ref):
    B = lng_ref.shape[0]
    loss = loss_ref[...]                                     # (B, 1) f32
    lng = lng_ref[...]                                       # (B, F) f32

    # --- Pearson correlation of loss vs each lng feature (scipy.pearsonr semantics) ---
    dl = loss - jnp.mean(loss, axis=0, keepdims=True)        # (B, 1)
    dg = lng - jnp.mean(lng, axis=0, keepdims=True)          # (B, F)
    cov = jnp.sum(dl * dg, axis=0, keepdims=True)            # (1, F)
    denom = jnp.sqrt(jnp.sum(dl * dl, axis=0, keepdims=True) *
                     jnp.sum(dg * dg, axis=0, keepdims=True))          # (1, F)
    # reciprocal-then-multiply; exact (approx=False) so class thresholds can't flip.
    corrs = cov * pl.reciprocal(denom, approx=False)
    means = jnp.where(jnp.isnan(corrs), 0.0, corrs)          # torch.nan_to_num; first-call means

    # --- weighted projection ---
    inv_mnorm = pl.reciprocal(
        jnp.sqrt(jnp.sum(means * means, keepdims=True)), approx=False)       # (1, 1)
    lng_w = jnp.sum(lng * means, axis=1, keepdims=True) * inv_mnorm          # (B, 1)

    # --- BatchNorm1d running-stat update (running_mean=0, running_var=1 before this step) ---
    mu_b = jnp.mean(lng_w)
    var_unbiased = jnp.sum((lng_w - mu_b) ** 2) / (B - 1)
    mu = _BN_MOMENTUM * mu_b
    std = jnp.sqrt((1.0 - _BN_MOMENTUM) * 1.0 + _BN_MOMENTUM * var_unbiased)

    # --- thresholds / class assignment / confidence ---
    t1 = mu - std * _Z_TWO_THIRDS      # norm.ppf(1/3, mu, std)
    t2 = mu + std * _Z_TWO_THIRDS      # norm.ppf(2/3, mu, std)
    cls = (jnp.where(lng_w >= t1, 1.0, 0.0) +
           jnp.where(lng_w >= t2, 1.0, 0.0))                 # 0 / 1 / 2 as f32, (B, 1)
    c2 = cls * (1.0 / 3.0)                                   # buffer c2 = [0, 1/3, 2/3]
    tp = tp_ref[0]
    conf_ref[...] = jax.nn.sigmoid(50.0 * (tp - c2))         # c1 = [50, 50, 50]


def lng_curriculum_forward(loss, training_progress, lng):
    """loss: (B,) f32, training_progress: python/jnp scalar, lng: (B, F) f32 -> conf (B,) f32."""
    B, F = lng.shape
    assert B > 1, "percentile path requires batch > 1 (BN / unbiased variance)"
    if loss.dtype != jnp.float32:
        loss = loss.astype(jnp.float32)
    if lng.dtype != jnp.float32:
        lng = lng.astype(jnp.float32)
    loss_col = loss.reshape(B, 1)                            # free bitcast, no transpose HLO
    tp = jnp.asarray([training_progress], dtype=jnp.float32)

    cost = pl.CostEstimate(
        flops=30 * B * F,                 # means/cov/denom/projection/BN/thresholding
        transcendentals=B + 8,            # sigmoid per element + a few sqrt/recip
        bytes_accessed=(F + 1 + 1) * B * 4 + 4,
    )

    conf = pl.pallas_call(
        lng_curriculum_kernel,
        out_shape=jax.ShapeDtypeStruct((B, 1), jnp.float32),
        in_specs=[
            pl.BlockSpec(memory_space=pltpu.MemorySpace.SMEM),   # training_progress scalar
            pl.BlockSpec(memory_space=pltpu.MemorySpace.VMEM),   # loss (B, 1)
            pl.BlockSpec(memory_space=pltpu.MemorySpace.VMEM),   # lng  (B, F), native layout
        ],
        out_specs=pl.BlockSpec(memory_space=pltpu.MemorySpace.VMEM),
        compiler_params=pltpu.CompilerParams(vmem_limit_bytes=16 * 1024 * 1024),
        cost_estimate=cost,
    )(tp, loss_col, lng)
    return conf.reshape(B)


def _reference(loss, training_progress, lng):
    """Pure-numpy float64 reference of the PyTorch forward (first call, percentile method)."""
    loss = np.asarray(loss, np.float64)
    lng = np.asarray(lng, np.float64)
    corrs = []
    for i in range(lng.shape[1]):
        dx = loss - loss.mean()
        dy = lng[:, i] - lng[:, i].mean()
        r = (dx * dy).sum() / np.sqrt((dx * dx).sum() * (dy * dy).sum())
        corrs.append(0.0 if np.isnan(r) else r)
    means = np.asarray(corrs)
    lng_w = (lng * means).sum(1) / np.sqrt((means ** 2).sum())
    B = lng_w.shape[0]
    mu_b = lng_w.mean()
    var_u = ((lng_w - mu_b) ** 2).sum() / (B - 1)
    mu = _BN_MOMENTUM * mu_b
    std = np.sqrt((1.0 - _BN_MOMENTUM) + _BN_MOMENTUM * var_u)
    t1 = mu - std * _Z_TWO_THIRDS
    t2 = mu + std * _Z_TWO_THIRDS
    cls = (lng_w >= t1).astype(np.float64) + (lng_w >= t2).astype(np.float64)
    x = 50.0 * (training_progress - cls / 3.0)
    return 1.0 / (1.0 + np.exp(-x))


if __name__ == "__main__":
    B, F = 128, 3
    key = jax.random.PRNGKey(0)
    k1, k2 = jax.random.split(key)
    loss = jax.random.uniform(k1, (B,), dtype=jnp.float32, minval=0.1, maxval=3.0)
    lng = jax.random.normal(k2, (B, F), dtype=jnp.float32)
    training_progress = 0.3

    conf = lng_curriculum_forward(loss, training_progress, lng)
    conf = jax.block_until_ready(conf)

    ref = _reference(np.asarray(loss), training_progress, np.asarray(lng))
    np.testing.assert_allclose(np.asarray(conf), ref, rtol=1e-4, atol=1e-3)

    print("KERNEL_OK")
</pallas_src>

<mosaic_0001>
module attributes {stable_mosaic.version = 11 : i64} {
  func.func @lng_curriculum_kernel(%arg0: memref<1xf32, #tpu.memory_space<smem>>, %arg1: memref<128x1xf32, #tpu.memory_space<vmem>>, %arg2: memref<128x3xf32, #tpu.memory_space<vmem>>, %arg3: memref<128x1xf32, #tpu.memory_space<vmem>>) attributes {dimension_semantics = [], scalar_prefetch = 0 : i64, scratch_operands = 0 : i64, tpu.core_type = #tpu.core_type<tc>} {
    %c0 = arith.constant 0 : index
    %c0_0 = arith.constant 0 : index
    %0 = vector.load %arg1[%c0, %c0_0] : memref<128x1xf32, #tpu.memory_space<vmem>>, vector<128x1xf32>
    %c0_1 = arith.constant 0 : index
    %c0_2 = arith.constant 0 : index
    %1 = vector.load %arg2[%c0_1, %c0_2] : memref<128x3xf32, #tpu.memory_space<vmem>>, vector<128x3xf32>
    %cst = arith.constant dense<0.000000e+00> : vector<1xf32>
    %2 = vector.multi_reduction <add>, %0, %cst [0] : vector<128x1xf32> to vector<1xf32>
    %3 = vector.shape_cast %2 : vector<1xf32> to vector<1x1xf32>
    %cst_3 = arith.constant 1.280000e+02 : f32
    %4 = vector.broadcast %cst_3 : f32 to vector<1x1xf32>
    %5 = arith.divf %3, %4 : vector<1x1xf32>
    %6 = vector.broadcast %5 : vector<1x1xf32> to vector<128x1xf32>
    %7 = arith.subf %0, %6 : vector<128x1xf32>
    %cst_4 = arith.constant dense<0.000000e+00> : vector<3xf32>
    %8 = vector.multi_reduction <add>, %1, %cst_4 [0] : vector<128x3xf32> to vector<3xf32>
    %9 = vector.shape_cast %8 : vector<3xf32> to vector<1x3xf32>
    %cst_5 = arith.constant 1.280000e+02 : f32
    %10 = vector.broadcast %cst_5 : f32 to vector<1x3xf32>
    %11 = arith.divf %9, %10 : vector<1x3xf32>
    %12 = vector.broadcast %11 : vector<1x3xf32> to vector<128x3xf32>
    %13 = arith.subf %1, %12 : vector<128x3xf32>
    %14 = vector.broadcast %7 : vector<128x1xf32> to vector<128x3xf32>
    %15 = arith.mulf %14, %13 : vector<128x3xf32>
    %cst_6 = arith.constant dense<0.000000e+00> : vector<3xf32>
    %16 = vector.multi_reduction <add>, %15, %cst_6 [0] : vector<128x3xf32> to vector<3xf32>
    %17 = vector.shape_cast %16 : vector<3xf32> to vector<1x3xf32>
    %18 = arith.mulf %7, %7 : vector<128x1xf32>
    %cst_7 = arith.constant dense<0.000000e+00> : vector<1xf32>
    %19 = vector.multi_reduction <add>, %18, %cst_7 [0] : vector<128x1xf32> to vector<1xf32>
    %20 = vector.shape_cast %19 : vector<1xf32> to vector<1x1xf32>
    %21 = arith.mulf %13, %13 : vector<128x3xf32>
    %cst_8 = arith.constant dense<0.000000e+00> : vector<3xf32>
    %22 = vector.multi_reduction <add>, %21, %cst_8 [0] : vector<128x3xf32> to vector<3xf32>
    %23 = vector.shape_cast %22 : vector<3xf32> to vector<1x3xf32>
    %24 = vector.broadcast %20 : vector<1x1xf32> to vector<1x3xf32>
    %25 = arith.mulf %24, %23 : vector<1x3xf32>
    %26 = math.sqrt %25 : vector<1x3xf32>
    %27 = tpu.reciprocal %26 : vector<1x3xf32> -> vector<1x3xf32>
    %28 = arith.mulf %17, %27 : vector<1x3xf32>
    %29 = arith.cmpf one, %28, %28 : vector<1x3xf32>
    %cst_9 = arith.constant 0.000000e+00 : f32
    %30 = vector.broadcast %cst_9 : f32 to vector<1x3xf32>
    %31 = arith.select %29, %30, %28 : vector<1x3xi1>, vector<1x3xf32>
    %32 = arith.mulf %31, %31 : vector<1x3xf32>
    %33 = vector.shape_cast %32 : vector<1x3xf32> to vector<1x1x3xf32>
    %cst_10 = arith.constant dense<0.000000e+00> : vector<1xf32>
    %34 = vector.multi_reduction <add>, %33, %cst_10 [1, 2] : vector<1x1x3xf32> to vector<1xf32>
    %35 = vector.shape_cast %34 : vector<1xf32> to vector<1x1x1xf32>
    %36 = vector.extract %35[0, 0, 0] : f32 from vector<1x1x1xf32>
    %37 = vector.broadcast %36 : f32 to vector<1x1xf32>
    %38 = math.sqrt %37 : vector<1x1xf32>
    %39 = tpu.reciprocal %38 : vector<1x1xf32> -> vector<1x1xf32>
    %40 = vector.broadcast %31 : vector<1x3xf32> to vector<128x3xf32>
    %41 = arith.mulf %1, %40 : vector<128x3xf32>
    %cst_11 = arith.constant dense<0.000000e+00> : vector<128xf32>
    %42 = vector.multi_reduction <add>, %41, %cst_11 [1] : vector<128x3xf32> to vector<128xf32>
    %43 = vector.shape_cast %42 : vector<128xf32> to vector<128x1xf32>
    %44 = vector.broadcast %39 : vector<1x1xf32> to vector<128x1xf32>
    %45 = arith.mulf %43, %44 : vector<128x1xf32>
    %46 = vector.shape_cast %45 : vector<128x1xf32> to vector<1x128x1xf32>
    %cst_12 = arith.constant dense<0.000000e+00> : vector<1xf32>
    %47 = vector.multi_reduction <add>, %46, %cst_12 [1, 2] : vector<1x128x1xf32> to vector<1xf32>
    %48 = vector.shape_cast %47 : vector<1xf32> to vector<1x1x1xf32>
    %49 = vector.extract %48[0, 0, 0] : f32 from vector<1x1x1xf32>
    %cst_13 = arith.constant 1.280000e+02 : f32
    %50 = arith.divf %49, %cst_13 : f32
    %51 = vector.broadcast %50 : f32 to vector<128x1xf32>
    %52 = arith.subf %45, %51 : vector<128x1xf32>
    %53 = arith.mulf %52, %52 : vector<128x1xf32>
    %54 = vector.shape_cast %53 : vector<128x1xf32> to vector<1x128x1xf32>
    %cst_14 = arith.constant dense<0.000000e+00> : vector<1xf32>
    %55 = vector.multi_reduction <add>, %54, %cst_14 [1, 2] : vector<1x128x1xf32> to vector<1xf32>
    %56 = vector.shape_cast %55 : vector<1xf32> to vector<1x1x1xf32>
    %57 = vector.extract %56[0, 0, 0] : f32 from vector<1x1x1xf32>
    %cst_15 = arith.constant 1.270000e+02 : f32
    %58 = arith.divf %57, %cst_15 : f32
    %cst_16 = arith.constant 1.000000e-01 : f32
    %59 = arith.mulf %cst_16, %50 : f32
    %cst_17 = arith.constant 1.000000e-01 : f32
    %60 = arith.mulf %cst_17, %58 : f32
    %cst_18 = arith.constant 0.899999976 : f32
    %61 = arith.addf %cst_18, %60 : f32
    %62 = math.sqrt %61 : f32
    %cst_19 = arith.constant 0.430727303 : f32
    %63 = arith.mulf %62, %cst_19 : f32
    %64 = arith.subf %59, %63 : f32
    %cst_20 = arith.constant 0.430727303 : f32
    %65 = arith.mulf %62, %cst_20 : f32
    %66 = arith.addf %59, %65 : f32
    %67 = vector.broadcast %64 : f32 to vector<128x1xf32>
    %68 = arith.cmpf oge, %45, %67 : vector<128x1xf32>
    %cst_21 = arith.constant 1.000000e+00 : f32
    %cst_22 = arith.constant 0.000000e+00 : f32
    %69 = vector.broadcast %cst_21 : f32 to vector<128x1xf32>
    %70 = vector.broadcast %cst_22 : f32 to vector<128x1xf32>
    %71 = arith.select %68, %69, %70 : vector<128x1xi1>, vector<128x1xf32>
    %72 = vector.broadcast %66 : f32 to vector<128x1xf32>
    %73 = arith.cmpf oge, %45, %72 : vector<128x1xf32>
    %cst_23 = arith.constant 1.000000e+00 : f32
    %cst_24 = arith.constant 0.000000e+00 : f32
    %74 = vector.broadcast %cst_23 : f32 to vector<128x1xf32>
    %75 = vector.broadcast %cst_24 : f32 to vector<128x1xf32>
    %76 = arith.select %73, %74, %75 : vector<128x1xi1>, vector<128x1xf32>
    %77 = arith.addf %71, %76 : vector<128x1xf32>
    %cst_25 = arith.constant 0.333333343 : f32
    %78 = vector.broadcast %cst_25 : f32 to vector<128x1xf32>
    %79 = arith.mulf %77, %78 : vector<128x1xf32>
    %c0_26 = arith.constant 0 : index
    %80 = memref.load %arg0[%c0_26] : memref<1xf32, #tpu.memory_space<smem>>
    %81 = vector.broadcast %80 : f32 to vector<128x1xf32>
    %82 = arith.subf %81, %79 : vector<128x1xf32>
    %cst_27 = arith.constant 5.000000e+01 : f32
    %83 = vector.broadcast %cst_27 : f32 to vector<128x1xf32>
    %84 = arith.mulf %83, %82 : vector<128x1xf32>
    %85 = arith.negf %84 : vector<128x1xf32>
    %86 = math.exp %85 : vector<128x1xf32>
    %cst_28 = arith.constant 1.000000e+00 : f32
    %87 = vector.broadcast %cst_28 : f32 to vector<128x1xf32>
    %88 = arith.addf %87, %86 : vector<128x1xf32>
    %89 = arith.divf %87, %88 : vector<128x1xf32>
    %c0_29 = arith.constant 0 : index
    %c0_30 = arith.constant 0 : index
    %90 = vector.load %arg3[%c0_29, %c0_30] : memref<128x1xf32, #tpu.memory_space<vmem>>, vector<128x1xf32>
    tpu.vector_store %arg3[%c0_29, %c0_30], %89 {strides = array<i32>} : memref<128x1xf32, #tpu.memory_space<vmem>>, vector<128x1xf32>,
    return
  }
}

</mosaic_0001>

<bundles_post_ra>
// kernel: tpu_custom_call.1
= control target key start
LH: loop header
LB: loop body
LE: loop exit
PB: predicated region body
PF: predicated region fallthrough
CT: control target
= control target key end

     0   :  { %vm2292_vm0 = vcmask 7168   ;;  %v1277_v0 = vmov 0   ;;  %v1278_v31 = vmov 128.0   ;;  %vm109_vm2 = vcmask 23552   ;;  %s2288_s1 = inlined_call_operand.vmem [shape: f32[128,1], index: 1, kind: input, shape index: {}]   ;;  %s2289_s2 = inlined_call_operand.vmem [shape: f32[128,3], index: 2, kind: input, shape index: {}]   ;;  %s2290_s0 = inlined_call_operand.<no memory space> [shape: f32[1], index: 0, kind: input, shape index: {}]   ;;  %s2291_s3 = inlined_call_operand.vmem [shape: f32[128,1], index: 3, kind: output, shape index: {}]  }
   0x1   :  { %1197 = vset.pattern.permute.xlu1 %v1277_v0  ;;  %1196 = vset.pattern.permute.xlu0 %v1277_v0  ;;  %v1304_v1 = vld [vmem:[%s2288_s1] sm:$0xff]  ;;  %v1309_v2 = vld [vmem:[%s2288_s1 + $0x8] sm:$0xff]  ;;  %v17_v3 = vld [vmem:[%s2288_s1 + $0x10] sm:$0xff]  ;;  %1199 = vrcp.f32 %v1278_v31  ;;  %vm439_vm10 = vcmask 16384  }
   0x2   :  { %v1317_v4 = vld [vmem:[%s2288_s1 + $0x18] sm:$0xff]  ;;  %v48_v5 = vsel %vm2292_vm0, %v1304_v1, 0.0  ;;  %v49_v6 = vsel %vm2292_vm0, %v1309_v2, 0.0  ;;  %v51_v7 = vsel %vm2292_vm0, %v17_v3, 0.0  ;;  %1198 = vset.pattern.permute.xlu2 %v1277_v0  ;;  %v1327_v8 = vld [vmem:[%s2288_s1 + $0x20] sm:$0xff]  ;;  %v1334_v11 = vld [vmem:[%s2288_s1 + $0x28] sm:$0xff] }
   0x3   :  { %v50_v9 = vadd.f32 %v49_v6, %v48_v5  ;;  %v53_v10 = vsel %vm2292_vm0, %v1317_v4, 0.0  ;;  %v55_v13 = vsel %vm2292_vm0, %v1327_v8, 0.0  ;;  %v1341_v14 = vld [vmem:[%s2288_s1 + $0x30] sm:$0xff]  ;;  %v57_v16 = vsel %vm2292_vm0, %v1334_v11, 0.0  ;;  %v1348_v17 = vld [vmem:[%s2288_s1 + $0x38] sm:$0xff]  ;;  %v1355_v20 = vld [vmem:[%s2288_s1 + $0x40] sm:$0xff] }
   0x4   :  { %v59_v19 = vsel %vm2292_vm0, %v1341_v14, 0.0  ;;  %v61_v22 = vsel %vm2292_vm0, %v1348_v17, 0.0  ;;  %v1362_v23 = vld [vmem:[%s2288_s1 + $0x48] sm:$0xff]  ;;  %v63_v25 = vsel %vm2292_vm0, %v1355_v20, 0.0  ;;  %v1369_v26 = vld [vmem:[%s2288_s1 + $0x50] sm:$0xff]  ;;  %v1376_v29 = vld [vmem:[%s2288_s1 + $0x58] sm:$0xff] }
   0x5   :  { %v52_v12 = vadd.f32 %v51_v7, %v50_v9  ;;  %v65_v28 = vsel %vm2292_vm0, %v1362_v23, 0.0  ;;  %v67_v32 = vsel %vm2292_vm0, %v1369_v26, 0.0  ;;  %v1383_v33 = vld [vmem:[%s2288_s1 + $0x60] sm:$0xff]  ;;  %v69_v35 = vsel %vm2292_vm0, %v1376_v29, 0.0  ;;  %v1390_v36 = vld [vmem:[%s2288_s1 + $0x68] sm:$0xff]  ;;  %v1397_v40 = vld [vmem:[%s2288_s1 + $0x70] sm:$0xff] }
   0x6   :  { %v71_v38 = vsel %vm2292_vm0, %v1383_v33, 0.0  ;;  %v73_v42 = vsel %vm2292_vm0, %v1390_v36, 0.0  ;;  %v1404_v43 = vld [vmem:[%s2288_s1 + $0x78] sm:$0xff]  ;;  %v75_v45 = vsel %vm2292_vm0, %v1397_v40, 0.0 }
   0x7   :  { %v54_v15 = vadd.f32 %v53_v10, %v52_v12  ;;  %v1200_v39 = vpop.eup %1199  ;;  %v77_v48 = vsel %vm2292_vm0, %v1404_v43, 0.0 }
   0x8   :  { %v86_v46 = vmul.f32 128.0, %v1200_v39  ;;  %vm90_vm1 = vweird.f32 %v1200_v39 }
   0x9   :  { %v56_v18 = vadd.f32 %v55_v13, %v54_v15 }
   0xa   :  { %v87_v50 = vsub.f32 1.0, %v86_v46 }
   0xb   :  { %v58_v21 = vadd.f32 %v57_v16, %v56_v18 }
   0xc   :  { %v88_v53 = vmul.f32 %v1200_v39, %v87_v50 }
   0xd   :  { %v60_v24 = vadd.f32 %v59_v19, %v58_v21 }
   0xe   :  { %v89_v56 = vadd.f32 %v1200_v39, %v88_v53 }
   0xf   :  { %v62_v27 = vadd.f32 %v61_v22, %v60_v24 }
  0x10   :  { %v1410_v59 = vsel %vm90_vm1, %v1200_v39, %v89_v56 }
  0x11   :  { %v64_v30 = vadd.f32 %v63_v25, %v62_v27 }
  0x13   :  { %v66_v34 = vadd.f32 %v65_v28, %v64_v30 }
  0x15   :  { %v68_v37 = vadd.f32 %v67_v32, %v66_v34 }
  0x17   :  { %v70_v41 = vadd.f32 %v69_v35, %v68_v37  ;;  %v1457_v35 = vld [vmem:[%s2289_s2 + $0x8] sm:$0xff] }
  0x18   :  { %v111_v39 = vsel %vm109_vm2, %v1457_v35, 0.0 }
  0x19   :  { %v72_v44 = vadd.f32 %v71_v38, %v70_v41 }
  0x1b   :  { %v74_v47 = vadd.f32 %v73_v42, %v72_v44  ;;  %v1469_v42 = vld [vmem:[%s2289_s2 + $0x10] sm:$0xff] }
  0x1d   :  { %v76_v49 = vadd.f32 %v75_v45, %v74_v47  ;;  %v113_v47 = vsel %vm109_vm2, %v1469_v42, 0.0 }
  0x1f   :  { %v78_v51 = vadd.f32 %v77_v48, %v76_v49  ;;  %v1481_v49 = vld [vmem:[%s2289_s2 + $0x18] sm:$0xff] }
  0x20   :  { %v115_v53 = vsel %vm109_vm2, %v1481_v49, 0.0 }
  0x21   :  { %v79_v52 = vrot.slane %v78_v51, 4 }
  0x23   :  { %v80_v54 = vadd.f32 %v79_v52, %v78_v51 }
  0x25   :  { %v81_v55 = vrot.slane %v80_v54, 2 }
  0x27   :  { %v82_v57 = vadd.f32 %v81_v55, %v80_v54  ;;  %v1493_v55 = vld [vmem:[%s2289_s2 + $0x20] sm:$0xff] }
  0x29   :  { %v83_v58 = vrot.slane %v82_v57, 1 }
  0x2b   :  { %v84_v60 = vadd.f32 %v83_v58, %v82_v57 }
  0x2d   :  { %v1413_v61 = vmul.f32 %v1410_v59, %v84_v60 }
  0x2f   :  { %v95_v62 = vsub.f32 %v17_v3, %v1413_v61  ;;  %v93_v63 = vsub.f32 %v1304_v1, %v1413_v61  ;;  %v96_v0 = vsub.f32 %v1317_v4, %v1413_v61  ;;  %v94_v5 = vsub.f32 %v1309_v2, %v1413_v61 }
  0x30   :  { %v98_v12 = vsub.f32 %v1334_v11, %v1413_v61  ;;  %v99_v4 = vsub.f32 %v1341_v14, %v1413_v61  ;;  %v97_v18 = vsub.f32 %v1327_v8, %v1413_v61  ;;  %v1434_v19 = vsub.f32 %v1348_v17, %v1413_v61 }
  0x31   :  { %176 = vperm.xlu1 %1197, %v95_v62   ;;  %v299_v6 = vmul.f32 %v95_v62, %v95_v62  ;;  %166 = vperm.xlu0 %1196, %v93_v63   ;;  %v297_v7 = vmul.f32 %v93_v63, %v93_v63  ;;  %v300_v9 = vmul.f32 %v96_v0, %v96_v0  ;;  %v1503_v63 = vld [vmem:[%s2289_s2 + $0x28] sm:$0xff] }
  0x32   :  { %v298_v10 = vmul.f32 %v94_v5, %v94_v5  ;;  %v302_v16 = vmul.f32 %v98_v12, %v98_v12  ;;  %v303_v21 = vmul.f32 %v99_v4, %v99_v4  ;;  %v101_v22 = vsub.f32 %v1355_v20, %v1413_v61  ;;  %186 = vperm.xlu2 %1198, %v97_v18  }
  0x33   :  { %v313_v3 = vsel %vm2292_vm0, %v297_v7, 0.0  ;;  %v316_v13 = vsel %vm2292_vm0, %v299_v6, 0.0  ;;  %v318_v2 = vsel %vm2292_vm0, %v300_v9, 0.0  ;;  %v301_v24 = vmul.f32 %v97_v18, %v97_v18 }
  0x34   :  { %v314_v1 = vsel %vm2292_vm0, %v298_v10, 0.0  ;;  %v102_v14 = vsub.f32 %v1362_v23, %v1413_v61  ;;  %v322_v27 = vsel %vm2292_vm0, %v302_v16, 0.0  ;;  %v304_v8 = vmul.f32 %v1434_v19, %v1434_v19  ;;  %v1452_v23 = vld [vmem:[%s2289_s2] sm:$0xff]  ;;  %v1515_v10 = vld [vmem:[%s2289_s2 + $0x30] sm:$0xff] }
  0x35   :  { %v315_v15 = vadd.f32 %v314_v1, %v313_v3  ;;  %v320_v17 = vsel %vm2292_vm0, %v301_v24, 0.0  ;;  %v324_v30 = vsel %vm2292_vm0, %v303_v21, 0.0  ;;  %v305_v31 = vmul.f32 %v101_v22, %v101_v22 }
  0x36   :  { %v1447_v20 = vsub.f32 %v1369_v26, %v1413_v61  ;;  %v306_v32 = vmul.f32 %v102_v14, %v102_v14  ;;  %v104_v37 = vsub.f32 %v1376_v29, %v1413_v61  ;;  %v326_v38 = vsel %vm2292_vm0, %v304_v8, 0.0 }
  0x37   :  { %v317_v11 = vadd.f32 %v316_v13, %v315_v15  ;;  %v110_v26 = vsel %vm109_vm2, %v1452_v23, 0.0  ;;  %v328_v45 = vsel %vm2292_vm0, %v305_v31, 0.0  ;;  %v105_v29 = vsub.f32 %v1383_v33, %v1413_v61 }
  0x38   :  { %v112_v44 = vadd.f32 %v111_v39, %v110_v26  ;;  %v307_v46 = vmul.f32 %v1447_v20, %v1447_v20  ;;  %v330_v51 = vsel %vm2292_vm0, %v306_v32, 0.0  ;;  %v308_v52 = vmul.f32 %v104_v37, %v104_v37 }
  0x39   :  { %181 = vperm.xlu1 %1197, %v96_v0   ;;  %171 = vperm.xlu0 %1196, %v94_v5   ;;  %v319_v25 = vadd.f32 %v318_v2, %v317_v11  ;;  %v1486_v33 = vsub.f32 %v1390_v36, %v1413_v61  ;;  %v309_v57 = vmul.f32 %v105_v29, %v105_v29  ;;  %v117_v36 = vsel %vm109_vm2, %v1493_v55, 0.0  ;;  %v1531_v11 = vld [vmem:[%s2289_s2 + $0x40] sm:$0xff] }
  0x3a   :  { %v114_v50 = vadd.f32 %v113_v47, %v112_v44  ;;  %v107_v58 = vsub.f32 %v1397_v40, %v1413_v61  ;;  %v332_v60 = vsel %vm2292_vm0, %v307_v46, 0.0  ;;  %v334_v5 = vsel %vm2292_vm0, %v308_v52, 0.0  ;;  %v1561_v44 = vld [vmem:[%s2289_s2 + $0x60] sm:$0xff]  ;;  %v1568_v46 = vld [vmem:[%s2289_s2 + $0x68] sm:$0xff]  ;;  %v1580_v52 = vld [vmem:[%s2289_s2 + $0x78] sm:$0xff] }
  0x3b   :  { %v321_v28 = vadd.f32 %v320_v17, %v319_v25  ;;  %v108_v6 = vsub.f32 %v1404_v43, %v1413_v61  ;;  %v310_v40 = vmul.f32 %v1486_v33, %v1486_v33  ;;  %v119_v7 = vsel %vm109_vm2, %v1503_v63, 0.0  ;;  %v1523_v61 = vld [vmem:[%s2289_s2 + $0x38] sm:$0xff]  ;;  %v1539_v25 = vld [vmem:[%s2289_s2 + $0x48] sm:$0xff] }
  0x3c   :  { %v116_v56 = vadd.f32 %v115_v53, %v114_v50  ;;  %v336_v3 = vsel %vm2292_vm0, %v309_v57, 0.0  ;;  %v311_v13 = vmul.f32 %v107_v58, %v107_v58  ;;  %v121_v1 = vsel %vm109_vm2, %v1515_v10, 0.0 }
  0x3d   :  { %v323_v34 = vadd.f32 %v322_v27, %v321_v28  ;;  %v312_v15 = vmul.f32 %v108_v6, %v108_v6  ;;  %v338_v2 = vsel %vm2292_vm0, %v310_v40, 0.0  ;;  %v123_v16 = vsel %vm109_vm2, %v1523_v61, 0.0 }
  0x3e   :  { %v118_v0 = vadd.f32 %v117_v36, %v116_v56  ;;  %v125_v24 = vsel %vm109_vm2, %v1531_v11, 0.0  ;;  %v127_v17 = vsel %vm109_vm2, %v1539_v25, 0.0  ;;  %v139_v56 = vsel %vm109_vm2, %v1580_v52, 0.0 }
  0x3f   :  { %v325_v41 = vadd.f32 %v324_v30, %v323_v34  ;;  %v342_v8 = vsel %vm2292_vm0, %v312_v15, 0.0  ;;  %v1547_v30 = vld [vmem:[%s2289_s2 + $0x50] sm:$0xff] }
  0x40   :  { %v129_v32 = vsel %vm109_vm2, %v1547_v30, 0.0 }
  0x41   :  { %196 = vperm.xlu1 %1197, %v99_v4   ;;  %191 = vperm.xlu0 %1196, %v98_v12   ;;  %v327_v48 = vadd.f32 %v326_v38, %v325_v41  ;;  %v120_v12 = vadd.f32 %v119_v7, %v118_v0  ;;  %v1554_v38 = vld [vmem:[%s2289_s2 + $0x58] sm:$0xff] }
  0x42   :  { %v131_v39 = vsel %vm109_vm2, %v1554_v38, 0.0 }
  0x43   :  { %v329_v54 = vadd.f32 %v328_v45, %v327_v48  ;;  %v122_v4 = vadd.f32 %v121_v1, %v120_v12  ;;  %v135_v48 = vsel %vm109_vm2, %v1568_v46, 0.0 }
  0x45   :  { %v331_v62 = vadd.f32 %v330_v51, %v329_v54  ;;  %v124_v21 = vadd.f32 %v123_v16, %v122_v4  ;;  %v1575_v51 = vld [vmem:[%s2289_s2 + $0x70] sm:$0xff] }
  0x46   :  { %v137_v54 = vsel %vm109_vm2, %v1575_v51, 0.0 }
  0x47   :  { %v333_v9 = vadd.f32 %v332_v60, %v331_v62  ;;  %v126_v27 = vadd.f32 %v125_v24, %v124_v21 }
  0x49   :  { %211 = vperm.xlu1 %1197, %v102_v14   ;;  %206 = vperm.xlu0 %1196, %v101_v22   ;;  %v335_v43 = vadd.f32 %v334_v5, %v333_v9  ;;  %v340_v22 = vsel %vm2292_vm0, %v311_v13, 0.0  ;;  %v128_v31 = vadd.f32 %v127_v17, %v126_v27 }
  0x4b   :  { %v337_v18 = vadd.f32 %v336_v3, %v335_v43  ;;  %v130_v26 = vadd.f32 %v129_v32, %v128_v31 }
  0x4d   :  { %v339_v14 = vadd.f32 %v338_v2, %v337_v18  ;;  %v132_v45 = vadd.f32 %v131_v39, %v130_v26 }
  0x4f   :  { %v341_v28 = vadd.f32 %v340_v22, %v339_v14 }
  0x51   :  { %226 = vperm.xlu1 %1197, %v105_v29   ;;  %221 = vperm.xlu0 %1196, %v104_v37   ;;  %v343_v34 = vadd.f32 %v342_v8, %v341_v28  ;;  %v133_v37 = vsel %vm109_vm2, %v1561_v44, 0.0 }
  0x52   :  { %v134_v47 = vadd.f32 %v133_v37, %v132_v45 }
  0x53   :  { %v344_v41 = vrot.slane %v343_v34, 4 }
  0x54   :  { %v136_v53 = vadd.f32 %v135_v48, %v134_v47 }
  0x55   :  { %v345_v29 = vadd.f32 %v344_v41, %v343_v34 }
  0x56   :  { %v138_v60 = vadd.f32 %v137_v54, %v136_v53 }
  0x57   :  { %v346_v50 = vrot.slane %v345_v29, 2 }
  0x58   :  { %v140_v62 = vadd.f32 %v139_v56, %v138_v60 }
  0x59   :  { %241 = vperm.xlu1 %1197, %v108_v6   ;;  %236 = vperm.xlu0 %1196, %v107_v58   ;;  %v347_v57 = vadd.f32 %v346_v50, %v345_v29 }
  0x5a   :  { %v141_v5 = vrot.slane %v140_v62, 4 }
  0x5b   :  { %v348_v36 = vrot.slane %v347_v57, 1 }
  0x5c   :  { %v142_v40 = vadd.f32 %v141_v5, %v140_v62 }
  0x5d   :  { %v349_v0 = vadd.f32 %v348_v36, %v347_v57 }
  0x5e   :  { %v143_v7 = vrot.slane %v142_v40, 2 }
  0x5f   :  { %405 = vperm.xlu2 %1198, %v349_v0  }
  0x60   :  { %v144_v9 = vadd.f32 %v143_v7, %v142_v40 }
  0x62   :  { %v145_v12 = vrot.slane %v144_v9, 1 }
  0x64   :  { %v146_v3 = vadd.f32 %v145_v12, %v144_v9 }
  0x66   :  { %v147_v13 = vmul.f32 %v146_v3, %v1410_v59 }
  0x67   :  { %201 = vperm.xlu2 %1198, %v1434_v19  }
  0x68   :  { %v1589_v1 = vsub.f32 %v1469_v42, %v147_v13  ;;  %v1592_v58 = vsub.f32 %v1452_v23, %v147_v13  ;;  %v1595_v6 = vsub.f32 %v1457_v35, %v147_v13  ;;  %v1607_v16 = vsub.f32 %v1481_v49, %v147_v13 }
  0x69   :  { %v1613_v24 = vsub.f32 %v1493_v55, %v147_v13  ;;  %v1619_v8 = vsub.f32 %v1503_v63, %v147_v13  ;;  %v1623_v31 = vsub.f32 %v1515_v10, %v147_v13  ;;  %v1631_v39 = vsub.f32 %v1523_v61, %v147_v13 }
  0x6a   :  { %v352_v43 = vmul.f32 %v1589_v1, %v1589_v1  ;;  %v350_v4 = vmul.f32 %v1592_v58, %v1592_v58  ;;  %v351_v19 = vmul.f32 %v1595_v6, %v1595_v6  ;;  %v353_v22 = vmul.f32 %v1607_v16, %v1607_v16 }
  0x6b   :  { %v355_v32 = vmul.f32 %v1619_v8, %v1619_v8  ;;  %v356_v26 = vmul.f32 %v1623_v31, %v1623_v31  ;;  %v1636_v29 = vsub.f32 %v1531_v11, %v147_v13  ;;  %v357_v47 = vmul.f32 %v1631_v39, %v1631_v39 }
  0x6c   :  { %v369_v15 = vsel %vm109_vm2, %v352_v43, 0.0  ;;  %v366_v2 = vsel %vm109_vm2, %v350_v4, 0.0  ;;  %v367_v18 = vsel %vm109_vm2, %v351_v19, 0.0  ;;  %v371_v27 = vsel %vm109_vm2, %v353_v22, 0.0 }
  0x6d   :  { %v368_v21 = vadd.f32 %v367_v18, %v366_v2  ;;  %v375_v41 = vsel %vm109_vm2, %v355_v32, 0.0  ;;  %v377_v37 = vsel %vm109_vm2, %v356_v26, 0.0  ;;  %v358_v50 = vmul.f32 %v1636_v29, %v1636_v29 }
  0x6e   :  { %v379_v53 = vsel %vm109_vm2, %v357_v47, 0.0  ;;  %v1647_v56 = vsub.f32 %v1547_v30, %v147_v13  ;;  %v1656_v5 = vsub.f32 %v1554_v38, %v147_v13  ;;  %v1660_v9 = vsub.f32 %v1561_v44, %v147_v13 }
  0x6f   :  { %216 = vperm.xlu2 %1198, %v1447_v20   ;;  %v370_v14 = vadd.f32 %v369_v15, %v368_v21  ;;  %v354_v20 = vmul.f32 %v1613_v24, %v1613_v24  ;;  %v381_v60 = vsel %vm109_vm2, %v358_v50, 0.0  ;;  %v1665_v43 = vsub.f32 %v1568_v46, %v147_v13 }
  0x70   :  { %v360_v62 = vmul.f32 %v1647_v56, %v1647_v56  ;;  %v361_v12 = vmul.f32 %v1656_v5, %v1656_v5  ;;  %v362_v4 = vmul.f32 %v1660_v9, %v1660_v9  ;;  %v1671_v2 = vsub.f32 %v1575_v51, %v147_v13 }
  0x71   :  { %v372_v17 = vadd.f32 %v371_v27, %v370_v14  ;;  %v373_v28 = vsel %vm109_vm2, %v354_v20, 0.0  ;;  %v363_v18 = vmul.f32 %v1665_v43, %v1665_v43  ;;  %v1677_v14 = vsub.f32 %v1580_v52, %v147_v13 }
  0x72   :  { %v385_v7 = vsel %vm109_vm2, %v360_v62, 0.0  ;;  %v387_v19 = vsel %vm109_vm2, %v361_v12, 0.0  ;;  %v389_v21 = vsel %vm109_vm2, %v362_v4, 0.0  ;;  %v364_v27 = vmul.f32 %v1671_v2, %v1671_v2 }
  0x73   :  { %v374_v34 = vadd.f32 %v373_v28, %v372_v17  ;;  %v391_v20 = vsel %vm109_vm2, %v363_v18, 0.0  ;;  %v365_v28 = vmul.f32 %v1677_v14, %v1677_v14 }
  0x74   :  { %v393_v32 = vsel %vm109_vm2, %v364_v27, 0.0 }
  0x75   :  { %v376_v45 = vadd.f32 %v375_v41, %v374_v34  ;;  %v395_v26 = vsel %vm109_vm2, %v365_v28, 0.0 }
  0x77   :  { %231 = vperm.xlu2 %1198, %v1486_v33   ;;  %v378_v48 = vadd.f32 %v377_v37, %v376_v45  ;;  %v1641_v33 = vsub.f32 %v1539_v25, %v147_v13 }
  0x79   :  { %v380_v54 = vadd.f32 %v379_v53, %v378_v48  ;;  %v359_v57 = vmul.f32 %v1641_v33, %v1641_v33 }
  0x7b   :  { %v382_v36 = vadd.f32 %v381_v60, %v380_v54  ;;  %v383_v0 = vsel %vm109_vm2, %v359_v57, 0.0 }
  0x7d   :  { %v384_v40 = vadd.f32 %v383_v0, %v382_v36 }
  0x7f   :  { %v386_v3 = vadd.f32 %v385_v7, %v384_v40 }
  0x81   :  { %v388_v15 = vadd.f32 %v387_v19, %v386_v3 }
  0x83   :  { %v390_v22 = vadd.f32 %v389_v21, %v388_v15 }
  0x85   :  { %v392_v17 = vadd.f32 %v391_v20, %v390_v22 }
  0x87   :  { %v394_v34 = vadd.f32 %v393_v32, %v392_v17 }
  0x89   :  { %v396_v41 = vadd.f32 %v395_v26, %v394_v34 }
  0x8b   :  { %v397_v45 = vrot.slane %v396_v41, 4 }
  0x8c   :  { %v187_v7 = vpop.permute.xlu2 %186 }
  0x8d   :  { %v398_v13 = vadd.f32 %v397_v45, %v396_v41  ;;  %v248_v18 = vmul.f32 %v187_v7, %v1613_v24 }
  0x8f   :  { %v399_v50 = vrot.slane %v398_v13, 2 }
  0x91   :  { %v400_v0 = vadd.f32 %v399_v50, %v398_v13 }
  0x93   :  { %v401_v4 = vrot.slane %v400_v0, 1 }
  0x95   :  { %v402_v21 = vadd.f32 %v401_v4, %v400_v0 }
  0xa3   :  { %v177_v37 = vpop.permute.xlu1 %176  ;;  %v167_v47 = vpop.permute.xlu0 %166 }
  0xa4   :  { %v244_v48 = vmul.f32 %v167_v47, %v1592_v58  ;;  %v246_v57 = vmul.f32 %v177_v37, %v1589_v1 }
  0xa6   :  { %v260_v60 = vsel %vm109_vm2, %v244_v48, 0.0  ;;  %v263_v12 = vsel %vm109_vm2, %v246_v57, 0.0 }
  0xab   :  { %v182_v53 = vpop.permute.xlu1 %181  ;;  %v172_v54 = vpop.permute.xlu0 %171 }
  0xac   :  { %v245_v36 = vmul.f32 %v172_v54, %v1595_v6  ;;  %v247_v3 = vmul.f32 %v182_v53, %v1607_v16  ;;  %v267_v6 = vsel %vm109_vm2, %v248_v18, 0.0 }
  0xae   :  { %v261_v62 = vsel %vm109_vm2, %v245_v36, 0.0  ;;  %v265_v1 = vsel %vm109_vm2, %v247_v3, 0.0 }
  0xaf   :  { %v262_v40 = vadd.f32 %v261_v62, %v260_v60 }
  0xb1   :  { %v264_v58 = vadd.f32 %v263_v12, %v262_v40 }
  0xb3   :  { %v197_v19 = vpop.permute.xlu1 %196  ;;  %v192_v15 = vpop.permute.xlu0 %191  ;;  %v266_v22 = vadd.f32 %v265_v1, %v264_v58 }
  0xb4   :  { %v249_v27 = vmul.f32 %v192_v15, %v1619_v8  ;;  %v250_v26 = vmul.f32 %v197_v19, %v1623_v31 }
  0xb5   :  { %v268_v28 = vadd.f32 %v267_v6, %v266_v22 }
  0xb6   :  { %v269_v16 = vsel %vm109_vm2, %v249_v27, 0.0  ;;  %v271_v37 = vsel %vm109_vm2, %v250_v26, 0.0 }
  0xb7   :  { %v270_v41 = vadd.f32 %v269_v16, %v268_v28 }
  0xb9   :  { %v406_v20 = vpop.permute.xlu2 %405  ;;  %v272_v48 = vadd.f32 %v271_v37, %v270_v41 }
  0xba   :  { %v408_v17 = vmul.f32 %v406_v20, %v402_v21 }
  0xbb   :  { %v207_v32 = vpop.permute.xlu0 %206  ;;  %v212_v34 = vpop.permute.xlu1 %211 }
  0xbc   :  { %1201 = vrsqrt.f32 %v408_v17  ;;  %v252_v47 = vmul.f32 %v207_v32, %v1636_v29  ;;  %v253_v60 = vmul.f32 %v212_v34, %v1641_v33  ;;  %vm416_vm3 = vcmp.eq.f32.partialorder %v408_v17, inf }
  0xbd   :  { %v419_v33 = vand.u32 2147483648, %v408_v17  ;;  %vm418_vm4 = vcmp.eq.f32.partialorder %v408_v17, 0.0 }
  0xbe   :  { %v275_v31 = vsel %vm109_vm2, %v252_v47, 0.0  ;;  %v277_v29 = vsel %vm109_vm2, %v253_v60, 0.0 }
  0xc1   :  { %v202_v24 = vpop.permute.xlu2 %201 }
  0xc2   :  { %v1202_v45 = vpop.eup %1201  ;;  %v251_v13 = vmul.f32 %v202_v24, %v1631_v39 }
  0xc3   :  { %v410_v8 = vmul.f32 %v1202_v45, %v408_v17  ;;  %v222_v57 = vpop.permute.xlu0 %221  ;;  %v227_v0 = vpop.permute.xlu1 %226 }
  0xc4   :  { %v273_v50 = vsel %vm109_vm2, %v251_v13, 0.0  ;;  %v255_v39 = vmul.f32 %v222_v57, %v1656_v5  ;;  %v256_v18 = vmul.f32 %v227_v0, %v1660_v9 }
  0xc5   :  { %v411_v53 = vmul.f32 %v1202_v45, %v410_v8  ;;  %v274_v54 = vadd.f32 %v273_v50, %v272_v48 }
  0xc6   :  { %v281_v1 = vsel %vm109_vm2, %v255_v39, 0.0  ;;  %v283_v20 = vsel %vm109_vm2, %v256_v18, 0.0 }
  0xc7   :  { %v412_v36 = vmul.f32 0.5, %v411_v53  ;;  %v276_v62 = vadd.f32 %v275_v31, %v274_v54 }
  0xc9   :  { %v413_v40 = vsub.f32 1.5, %v412_v36  ;;  %v217_v7 = vpop.permute.xlu2 %216  ;;  %v278_v4 = vadd.f32 %v277_v29, %v276_v62 }
  0xca   :  { %v254_v12 = vmul.f32 %v217_v7, %v1647_v56 }
  0xcb   :  { %v414_v3 = vmul.f32 %v1202_v45, %v413_v40  ;;  %v237_v6 = vpop.permute.xlu0 %236  ;;  %v242_v5 = vpop.permute.xlu1 %241 }
  0xcc   :  { %v279_v58 = vsel %vm109_vm2, %v254_v12, 0.0  ;;  %v258_v28 = vmul.f32 %v237_v6, %v1671_v2  ;;  %v259_v34 = vmul.f32 %v242_v5, %v1677_v14 }
  0xcd   :  { %v415_v19 = vmul.f32 %v414_v3, %v408_v17  ;;  %v280_v15 = vadd.f32 %v279_v58, %v278_v4 }
  0xce   :  { %v289_v45 = vsel %vm109_vm2, %v259_v34, 0.0 }
  0xcf   :  { %v417_v21 = vsel %vm416_vm3, %v408_v17, %v415_v19  ;;  %v282_v22 = vadd.f32 %v281_v1, %v280_v15  ;;  %v287_v17 = vsel %vm109_vm2, %v258_v28, 0.0 }
  0xd0   :  { %v420_v27 = vsel %vm418_vm4, %v419_v33, %v417_v21 }
  0xd1   :  { %1203 = vrcp.f32 %v420_v27  ;;  %v232_v56 = vpop.permute.xlu2 %231  ;;  %v284_v16 = vadd.f32 %v283_v20, %v282_v22  ;;  %v432_v53 = vand.u32 2147483648, %v420_v27  ;;  %vm426_vm6 = vweird.f32 %v420_v27 }
  0xd2   :  { %v257_v32 = vmul.f32 %v232_v56, %v1665_v43  ;;  %v430_v14 = vand.u32 2147483647, %v420_v27 }
  0xd3   :  { %v433_v31 = vor.u32 1.1754944e-38, %v432_v53 }
  0xd4   :  { %v285_v9 = vsel %vm109_vm2, %v257_v32, 0.0  ;;  %vm431_vm8 = vcmp.eq.f32.partialorder %v430_v14, 8.507059e+37 }
  0xd5   :  { %v286_v26 = vadd.f32 %v285_v9, %v284_v16 }
  0xd7   :  { %v1204_v41 = vpop.eup %1203  ;;  %v288_v24 = vadd.f32 %v287_v17, %v286_v26 }
  0xd8   :  { %v422_v37 = vmul.f32 %v1204_v41, %v420_v27  ;;  %vm427_vm5 = vweird.f32 %v1204_v41 }
  0xd9   :  { %v290_v47 = vadd.f32 %v289_v45, %v288_v24  ;;  %vm428_vm7 = vmor %vm426_vm6, %vm427_vm5 }
  0xda   :  { %v423_v13 = vsub.f32 1.0, %v422_v37 }
  0xdb   :  { %v291_v8 = vrot.slane %v290_v47, 4 }
  0xdc   :  { %v424_v48 = vmul.f32 %v1204_v41, %v423_v13 }
  0xdd   :  { %v292_v2 = vadd.f32 %v291_v8, %v290_v47 }
  0xde   :  { %v425_v50 = vadd.f32 %v1204_v41, %v424_v48 }
  0xdf   :  { %v293_v43 = vrot.slane %v292_v2, 2 }
  0xe0   :  { %v429_v57 = vsel %vm428_vm7, %v1204_v41, %v425_v50 }
  0xe1   :  { %v294_v54 = vadd.f32 %v293_v43, %v292_v2  ;;  %v434_v62 = vsel %vm431_vm8, %v433_v31, %v429_v57 }
  0xe3   :  { %v295_v60 = vrot.slane %v294_v54, 1 }
  0xe5   :  { %v296_v36 = vadd.f32 %v295_v60, %v294_v54 }
  0xe7   :  { %v435_v0 = vmul.f32 %v434_v62, %v296_v36 }
  0xe9   :  { %vm436_vm9 = vcmp.ne.f32.partialorder %v435_v0, %v435_v0 }
  0xea   :  { %v437_v40 = vsel %vm436_vm9, 0.0, %v435_v0 }
  0xeb   :  { %v478_v7 = vmul.f32 %v437_v40, %v1457_v35  ;;  %v477_v29 = vmul.f32 %v437_v40, %v1452_v23  ;;  %v438_v39 = vmul.f32 %v437_v40, %v437_v40  ;;  %v482_v58 = vmul.f32 %v437_v40, %v1503_v63 }
  0xec   :  { %v481_v19 = vmul.f32 %v437_v40, %v1493_v55  ;;  %v479_v15 = vmul.f32 %v437_v40, %v1469_v42  ;;  %v485_v18 = vmul.f32 %v437_v40, %v1531_v11  ;;  %v484_v1 = vmul.f32 %v437_v40, %v1523_v61 }
  0xed   :  { %v496_v12 = vsel %vm109_vm2, %v478_v7, 0.0  ;;  %v493_v3 = vsel %vm109_vm2, %v477_v29, 0.0  ;;  %v440_v4 = vsel %vm439_vm10, %v438_v39, 0.0  ;;  %v508_v33 = vsel %vm109_vm2, %v482_v58, 0.0 }
  0xee   :  { %497 = vadd.xlane.f32.xlu1 %v496_v12  ;;  %494 = vadd.xlane.f32.xlu0 %v493_v3  ;;  %v505_v35 = vsel %vm109_vm2, %v481_v19, 0.0  ;;  %v499_v23 = vsel %vm109_vm2, %v479_v15, 0.0  ;;  %v480_v21 = vmul.f32 %v437_v40, %v1481_v49  ;;  %v517_v63 = vsel %vm109_vm2, %v485_v18, 0.0 }
  0xef   :  { %441 = vadd.xlane.f32.xlu2 %v440_v4  ;;  %v514_v55 = vsel %vm109_vm2, %v484_v1, 0.0  ;;  %v488_v22 = vmul.f32 %v437_v40, %v1554_v38  ;;  %v487_v6 = vmul.f32 %v437_v40, %v1547_v30  ;;  %v483_v27 = vmul.f32 %v437_v40, %v1515_v10 }
  0xf0   :  { %v502_v42 = vsel %vm109_vm2, %v480_v21, 0.0  ;;  %v491_v5 = vmul.f32 %v437_v40, %v1575_v51  ;;  %v490_v56 = vmul.f32 %v437_v40, %v1568_v46  ;;  %v486_v20 = vmul.f32 %v437_v40, %v1539_v25 }
  0xf1   :  { %v526_v11 = vsel %vm109_vm2, %v488_v22, 0.0  ;;  %v523_v61 = vsel %vm109_vm2, %v487_v6, 0.0  ;;  %v511_v49 = vsel %vm109_vm2, %v483_v27, 0.0  ;;  %v489_v28 = vmul.f32 %v437_v40, %v1561_v44 }
  0xf2   :  { %v535_v38 = vsel %vm109_vm2, %v491_v5, 0.0  ;;  %v532_v30 = vsel %vm109_vm2, %v490_v56, 0.0  ;;  %v520_v10 = vsel %vm109_vm2, %v486_v20, 0.0  ;;  %v492_v51 = vmul.f32 %v437_v40, %v1580_v52 }
  0xf3   :  { %v529_v32 = vsel %vm109_vm2, %v489_v28, 0.0 }
  0xf4   :  { %v538_v46 = vsel %vm109_vm2, %v492_v51, 0.0 }
  0xf6   :  { %509 = vadd.xlane.f32.xlu1 %v508_v33  ;;  %506 = vadd.xlane.f32.xlu0 %v505_v35 }
  0xf7   :  { %500 = vadd.xlane.f32.xlu2 %v499_v23 }
  0xfe   :  { %518 = vadd.xlane.f32.xlu1 %v517_v63  ;;  %515 = vadd.xlane.f32.xlu0 %v514_v55 }
  0xff   :  { %503 = vadd.xlane.f32.xlu2 %v502_v42 }
 0x106   :  { %527 = vadd.xlane.f32.xlu1 %v526_v11  ;;  %524 = vadd.xlane.f32.xlu0 %v523_v61 }
 0x107   :  { %512 = vadd.xlane.f32.xlu2 %v511_v49 }
 0x10e   :  { %536 = vadd.xlane.f32.xlu1 %v535_v38  ;;  %533 = vadd.xlane.f32.xlu0 %v532_v30 }
 0x10f   :  { %521 = vadd.xlane.f32.xlu2 %v520_v10 }
 0x117   :  { %530 = vadd.xlane.f32.xlu2 %v529_v32 }
 0x11f   :  { %539 = vadd.xlane.f32.xlu2 %v538_v46 }
 0x161   :  { %v495_v53 = vpop.xlane.xlu0 %494  ;;  %v498_v14 = vpop.xlane.xlu1 %497 }
 0x162   :  { %v442_v25 = vpop.xlane.xlu2 %441 }
 0x163   :  { %v443_v16 = vrot.slane %v442_v25, 4 }
 0x165   :  { %v444_v34 = vadd.f32 %v443_v16, %v442_v25 }
 0x167   :  { %v445_v9 = vrot.slane %v444_v34, 2 }
 0x169   :  { %v446_v26 = vadd.f32 %v445_v9, %v444_v34  ;;  %v507_v36 = vpop.xlane.xlu0 %506  ;;  %v510_v7 = vpop.xlane.xlu1 %509 }
 0x16a   :  { %v501_v52 = vpop.xlane.xlu2 %500 }
 0x16b   :  { %v447_v17 = vrot.slane %v446_v26, 1 }
 0x16d   :  { %v448_v41 = vadd.f32 %v447_v17, %v446_v26 }
 0x16f   :  { %1180 = vpush %v448_v41 }
 0x171   :  { %v516_v33 = vpop.xlane.xlu0 %515  ;;  %v519_v1 = vpop.xlane.xlu1 %518 }
 0x172   :  { %v504_v54 = vpop.xlane.xlu2 %503 }
 0x179   :  { %v525_v38 = vpop.xlane.xlu0 %524  ;;  %v528_v32 = vpop.xlane.xlu1 %527 }
 0x17a   :  { %v513_v39 = vpop.xlane.xlu2 %512 }
 0x182   :  { %v522_v42 = vpop.xlane.xlu2 %521 }
 0x18a   :  { %v531_v16 = vpop.xlane.xlu2 %530 }
 0x1a0   :  { %s1181_s2 = spop %1180 }
 0x1a1   :  { %v450_v24 = vstv %s1181_s2 }
 0x1a2   :  { %1205 = vrsqrt.f32 %v450_v24  ;;  %vm458_vm11 = vcmp.eq.f32.partialorder %v450_v24, inf  ;;  %v461_v2 = vand.u32 2147483648, %v450_v24  ;;  %vm460_vm12 = vcmp.eq.f32.partialorder %v450_v24, 0.0 }
 0x1a8   :  { %v1206_v44 = vpop.eup %1205 }
 0x1a9   :  { %v452_v45 = vmul.f32 %v1206_v44, %v450_v24 }
 0x1ab   :  { %v453_v37 = vmul.f32 %v1206_v44, %v452_v45 }
 0x1ad   :  { %v454_v47 = vmul.f32 0.5, %v453_v37 }
 0x1af   :  { %v455_v13 = vsub.f32 1.5, %v454_v47  ;;  %v534_v47 = vpop.xlane.xlu0 %533 }
 0x1b1   :  { %v456_v8 = vmul.f32 %v1206_v44, %v455_v13 }
 0x1b3   :  { %v457_v48 = vmul.f32 %v456_v8, %v450_v24 }
 0x1b5   :  { %v459_v50 = vsel %vm458_vm11, %v450_v24, %v457_v48  ;;  %v537_v48 = vpop.xlane.xlu1 %536 }
 0x1b6   :  { %v462_v43 = vsel %vm460_vm12, %v461_v2, %v459_v50 }
 0x1b7   :  { %1207 = vrcp.f32 %v462_v43  ;;  %v474_v62 = vand.u32 2147483648, %v462_v43  ;;  %v472_v40 = vand.u32 2147483647, %v462_v43  ;;  %vm468_vm14 = vweird.f32 %v462_v43 }
 0x1b9   :  { %v475_v12 = vor.u32 1.1754944e-38, %v474_v62  ;;  %vm473_vm1 = vcmp.eq.f32.partialorder %v472_v40, 8.507059e+37 }
 0x1bd   :  { %v1208_v57 = vpop.eup %1207 }
 0x1be   :  { %v464_v60 = vmul.f32 %v1208_v57, %v462_v43  ;;  %vm469_vm13 = vweird.f32 %v1208_v57 }
 0x1bf   :  { %vm470_vm15 = vmor %vm468_vm14, %vm469_vm13 }
 0x1c0   :  { %v465_v31 = vsub.f32 1.0, %v464_v60 }
 0x1c2   :  { %v466_v0 = vmul.f32 %v1208_v57, %v465_v31 }
 0x1c4   :  { %v467_v29 = vadd.f32 %v1208_v57, %v466_v0 }
 0x1c6   :  { %v471_v3 = vsel %vm470_vm15, %v1208_v57, %v467_v29 }
 0x1c7   :  { %v476_v4 = vsel %vm473_vm1, %v475_v12, %v471_v3 }
 0x1c8   :  { %v1750_v58 = vmul.f32 %v495_v53, %v476_v4  ;;  %v1752_v19 = vmul.f32 %v498_v14, %v476_v4  ;;  %v1754_v15 = vmul.f32 %v501_v52, %v476_v4  ;;  %v1756_v35 = vmul.f32 %v504_v54, %v476_v4  ;;  %v540_v53 = vpop.xlane.xlu2 %539 }
 0x1c9   :  { %v1762_v63 = vmul.f32 %v507_v36, %v476_v4  ;;  %v1766_v6 = vmul.f32 %v510_v7, %v476_v4  ;;  %v1770_v61 = vmul.f32 %v513_v39, %v476_v4  ;;  %v1774_v56 = vmul.f32 %v516_v33, %v476_v4 }
 0x1ca   :  { %v557_v23 = vsel %vm2292_vm0, %v1750_v58, 0.0  ;;  %v558_v18 = vsel %vm2292_vm0, %v1752_v19, 0.0  ;;  %v560_v55 = vsel %vm2292_vm0, %v1754_v15, 0.0  ;;  %v562_v27 = vsel %vm2292_vm0, %v1756_v35, 0.0 }
 0x1cb   :  { %v559_v21 = vadd.f32 %v558_v18, %v557_v23  ;;  %v564_v49 = vsel %vm2292_vm0, %v1762_v63, 0.0  ;;  %v566_v20 = vsel %vm2292_vm0, %v1766_v6, 0.0  ;;  %v1778_v10 = vmul.f32 %v519_v1, %v476_v4 }
 0x1cc   :  { %v568_v28 = vsel %vm2292_vm0, %v1770_v61, 0.0  ;;  %v1782_v46 = vmul.f32 %v522_v42, %v476_v4  ;;  %v570_v25 = vsel %vm2292_vm0, %v1774_v56, 0.0  ;;  %v1786_v9 = vmul.f32 %v525_v38, %v476_v4 }
 0x1cd   :  { %v561_v22 = vadd.f32 %v560_v55, %v559_v21  ;;  %v572_v26 = vsel %vm2292_vm0, %v1778_v10, 0.0  ;;  %v1790_v41 = vmul.f32 %v528_v32, %v476_v4  ;;  %v1794_v45 = vmul.f32 %v531_v16, %v476_v4 }
 0x1ce   :  { %v574_v24 = vsel %vm2292_vm0, %v1782_v46, 0.0  ;;  %v576_v37 = vsel %vm2292_vm0, %v1786_v9, 0.0  ;;  %v1798_v52 = vmul.f32 %v534_v47, %v476_v4  ;;  %v1802_v50 = vmul.f32 %v537_v48, %v476_v4 }
 0x1cf   :  { %v563_v11 = vadd.f32 %v562_v27, %v561_v22  ;;  %v578_v8 = vsel %vm2292_vm0, %v1790_v41, 0.0  ;;  %v580_v43 = vsel %vm2292_vm0, %v1794_v45, 0.0  ;;  %v1806_v54 = vmul.f32 %v540_v53, %v476_v4 }
 0x1d0   :  { %v582_v57 = vsel %vm2292_vm0, %v1798_v52, 0.0  ;;  %v584_v31 = vsel %vm2292_vm0, %v1802_v50, 0.0 }
 0x1d1   :  { %v565_v5 = vadd.f32 %v564_v49, %v563_v11  ;;  %v586_v62 = vsel %vm2292_vm0, %v1806_v54, 0.0 }
 0x1d3   :  { %v567_v30 = vadd.f32 %v566_v20, %v565_v5 }
 0x1d5   :  { %v569_v51 = vadd.f32 %v568_v28, %v567_v30 }
 0x1d7   :  { %v571_v34 = vadd.f32 %v570_v25, %v569_v51 }
 0x1d9   :  { %v573_v17 = vadd.f32 %v572_v26, %v571_v34 }
 0x1db   :  { %v575_v44 = vadd.f32 %v574_v24, %v573_v17 }
 0x1dd   :  { %v577_v13 = vadd.f32 %v576_v37, %v575_v44 }
 0x1df   :  { %v579_v2 = vadd.f32 %v578_v8, %v577_v13 }
 0x1e1   :  { %v581_v14 = vadd.f32 %v580_v43, %v579_v2 }
 0x1e3   :  { %v583_v60 = vadd.f32 %v582_v57, %v581_v14 }
 0x1e5   :  { %v585_v36 = vadd.f32 %v584_v31, %v583_v60 }
 0x1e7   :  { %v587_v0 = vadd.f32 %v586_v62, %v585_v36 }
 0x1e9   :  { %588 = vadd.xlane.f32.xlu0 %v587_v0 }
 0x25c   :  { %v589_v40 = vpop.xlane.xlu0 %588 }
 0x25d   :  { %v590_v7 = vrot.slane %v589_v40, 4 }
 0x25f   :  { %v591_v29 = vadd.f32 %v590_v7, %v589_v40 }
 0x261   :  { %v592_v39 = vrot.slane %v591_v29, 2 }
 0x263   :  { %v593_v12 = vadd.f32 %v592_v39, %v591_v29 }
 0x265   :  { %v594_v3 = vrot.slane %v593_v12, 1 }
 0x267   :  { %v595_v4 = vadd.f32 %v594_v3, %v593_v12 }
 0x269   :  { %1182 = vpush %v595_v4 }
 0x26a   :  { %1184 = vpush %v1410_v59 }
 0x29a   :  { %s1183_s20 = spop %1182 }
 0x29b   :  { %s1185_s21 = spop %1184 }
 0x29c   :  { %s1815_s22 = smul.f32 %s1185_s21, %s1183_s20 }
 0x29e   :  { %v606_v33 = vstv %s1815_s22  ;;  %s688_s28 = smul.f32 0.1, %s1815_s22 }
 0x29f   :  { %v607_v23 = vsub.f32 %v1750_v58, %v606_v33  ;;  %v608_v18 = vsub.f32 %v1752_v19, %v606_v33  ;;  %v609_v1 = vsub.f32 %v1754_v15, %v606_v33  ;;  %v610_v21 = vsub.f32 %v1756_v35, %v606_v33 }
 0x2a0   :  { %v611_v22 = vsub.f32 %v1762_v63, %v606_v33  ;;  %v612_v59 = vsub.f32 %v1766_v6, %v606_v33  ;;  %v613_v38 = vsub.f32 %v1770_v61, %v606_v33  ;;  %v614_v51 = vsub.f32 %v1774_v56, %v606_v33 }
 0x2a1   :  { %v623_v55 = vmul.f32 %v607_v23, %v607_v23  ;;  %v624_v42 = vmul.f32 %v608_v18, %v608_v18  ;;  %v625_v27 = vmul.f32 %v609_v1, %v609_v1  ;;  %v626_v11 = vmul.f32 %v610_v21, %v610_v21 }
 0x2a2   :  { %v627_v30 = vmul.f32 %v611_v22, %v611_v22  ;;  %v628_v25 = vmul.f32 %v612_v59, %v612_v59  ;;  %v615_v26 = vsub.f32 %v1778_v10, %v606_v33  ;;  %v629_v17 = vmul.f32 %v613_v38, %v613_v38 }
 0x2a3   :  { %v639_v49 = vsel %vm2292_vm0, %v623_v55, 0.0  ;;  %v640_v5 = vsel %vm2292_vm0, %v624_v42, 0.0  ;;  %v642_v28 = vsel %vm2292_vm0, %v625_v27, 0.0  ;;  %v644_v16 = vsel %vm2292_vm0, %v626_v11, 0.0 }
 0x2a4   :  { %v641_v20 = vadd.f32 %v640_v5, %v639_v49  ;;  %v646_v24 = vsel %vm2292_vm0, %v627_v30, 0.0  ;;  %v616_v37 = vsub.f32 %v1782_v46, %v606_v33  ;;  %v630_v47 = vmul.f32 %v614_v51, %v614_v51 }
 0x2a5   :  { %v648_v13 = vsel %vm2292_vm0, %v628_v25, 0.0  ;;  %v617_v48 = vsub.f32 %v1786_v9, %v606_v33  ;;  %v631_v2 = vmul.f32 %v615_v26, %v615_v26  ;;  %v650_v43 = vsel %vm2292_vm0, %v629_v17, 0.0 }
 0x2a6   :  { %v643_v32 = vadd.f32 %v642_v28, %v641_v20  ;;  %v618_v14 = vsub.f32 %v1790_v41, %v606_v33  ;;  %v632_v57 = vmul.f32 %v616_v37, %v616_v37  ;;  %v652_v60 = vsel %vm2292_vm0, %v630_v47, 0.0 }
 0x2a7   :  { %v619_v36 = vsub.f32 %v1794_v45, %v606_v33  ;;  %v633_v62 = vmul.f32 %v617_v48, %v617_v48  ;;  %v654_v0 = vsel %vm2292_vm0, %v631_v2, 0.0  ;;  %v620_v7 = vsub.f32 %v1798_v52, %v606_v33 }
 0x2a8   :  { %v645_v34 = vadd.f32 %v644_v16, %v643_v32  ;;  %v634_v29 = vmul.f32 %v618_v14, %v618_v14  ;;  %v656_v39 = vsel %vm2292_vm0, %v632_v57, 0.0  ;;  %v621_v3 = vsub.f32 %v1802_v50, %v606_v33 }
 0x2a9   :  { %v635_v4 = vmul.f32 %v619_v36, %v619_v36  ;;  %v658_v23 = vsel %vm2292_vm0, %v633_v62, 0.0  ;;  %v622_v1 = vsub.f32 %v1806_v54, %v606_v33  ;;  %v636_v21 = vmul.f32 %v620_v7, %v620_v7 }
 0x2aa   :  { %v647_v44 = vadd.f32 %v646_v24, %v645_v34  ;;  %v660_v55 = vsel %vm2292_vm0, %v634_v29, 0.0  ;;  %v637_v22 = vmul.f32 %v621_v3, %v621_v3  ;;  %v1279_v33 = vmov 127.0  }
 0x2ab   :  { %v662_v27 = vsel %vm2292_vm0, %v635_v4, 0.0  ;;  %v638_v11 = vmul.f32 %v622_v1, %v622_v1  ;;  %v664_v49 = vsel %vm2292_vm0, %v636_v21, 0.0  ;;  %1209 = vrcp.f32 %v1279_v33 }
 0x2ac   :  { %v649_v8 = vadd.f32 %v648_v13, %v647_v44  ;;  %v666_v20 = vsel %vm2292_vm0, %v637_v22, 0.0  ;;  %v1855_v7 = vstv %s2290_s0 }
 0x2ad   :  { %v668_v30 = vsel %vm2292_vm0, %v638_v11, 0.0 }
 0x2ae   :  { %v651_v53 = vadd.f32 %v650_v43, %v649_v8 }
 0x2b0   :  { %v653_v31 = vadd.f32 %v652_v60, %v651_v53 }
 0x2b1   :  { %v1210_v32 = vpop.eup %1209 }
 0x2b2   :  { %v655_v40 = vadd.f32 %v654_v0, %v653_v31  ;;  %v680_v51 = vmul.f32 127.0, %v1210_v32  ;;  %vm684_vm2 = vweird.f32 %v1210_v32 }
 0x2b4   :  { %v657_v12 = vadd.f32 %v656_v39, %v655_v40  ;;  %v681_v25 = vsub.f32 1.0, %v680_v51  ;;  %v1280_v39 = vmov 0.0  }
 0x2b6   :  { %v659_v18 = vadd.f32 %v658_v23, %v657_v12  ;;  %v682_v17 = vmul.f32 %v1210_v32, %v681_v25 }
 0x2b8   :  { %v661_v42 = vadd.f32 %v660_v55, %v659_v18  ;;  %v683_v37 = vadd.f32 %v1210_v32, %v682_v17 }
 0x2ba   :  { %v663_v59 = vadd.f32 %v662_v27, %v661_v42  ;;  %v685_v8 = vsel %vm684_vm2, %v1210_v32, %v683_v37 }
 0x2bc   :  { %v665_v5 = vadd.f32 %v664_v49, %v663_v59 }
 0x2be   :  { %v667_v38 = vadd.f32 %v666_v20, %v665_v5 }
 0x2c0   :  { %v669_v28 = vadd.f32 %v668_v30, %v667_v38 }
 0x2c2   :  { %670 = vadd.xlane.f32.xlu1 %v669_v28 }
 0x335   :  { %v671_v16 = vpop.xlane.xlu1 %670 }
 0x336   :  { %v672_v34 = vrot.slane %v671_v16, 4 }
 0x338   :  { %v673_v26 = vadd.f32 %v672_v34, %v671_v16 }
 0x33a   :  { %v674_v24 = vrot.slane %v673_v26, 2 }
 0x33c   :  { %v675_v44 = vadd.f32 %v674_v24, %v673_v26 }
 0x33e   :  { %v676_v47 = vrot.slane %v675_v44, 1 }
 0x340   :  { %v677_v13 = vadd.f32 %v676_v47, %v675_v44 }
 0x342   :  { %1186 = vpush %v677_v13 }
 0x343   :  { %1188 = vpush %v685_v8 }
 0x373   :  { %s1187_s23 = spop %1186 }
 0x374   :  { %s1189_s24 = spop %1188 }
 0x375   :  { %s687_s25 = smul.f32 %s1189_s24, %s1187_s23 }
 0x377   :  { %s689_s26 = smul.f32 0.1, %s687_s25 }
 0x379   :  { %s690_s27 = sadd.f32 0.9, %s689_s26 }
 0x37b   :  { %v691_v48 = vstv %s690_s27 }
 0x37c   :  { %1211 = vrsqrt.f32 %v691_v48  ;;  %vm699_vm3 = vcmp.eq.f32.partialorder %v691_v48, inf  ;;  %v702_v36 = vand.u32 2147483648, %v691_v48  ;;  %vm701_vm4 = vcmp.eq.f32.partialorder %v691_v48, 0.0 }
 0x382   :  { %v1212_v2 = vpop.eup %1211 }
 0x383   :  { %v693_v43 = vmul.f32 %v1212_v2, %v691_v48 }
 0x385   :  { %v694_v53 = vmul.f32 %v1212_v2, %v693_v43 }
 0x387   :  { %v695_v14 = vmul.f32 0.5, %v694_v53 }
 0x389   :  { %v696_v57 = vsub.f32 1.5, %v695_v14 }
 0x38b   :  { %v697_v60 = vmul.f32 %v1212_v2, %v696_v57 }
 0x38d   :  { %v698_v31 = vmul.f32 %v697_v60, %v691_v48 }
 0x38f   :  { %v700_v62 = vsel %vm699_vm3, %v691_v48, %v698_v31 }
 0x390   :  { %v703_v0 = vsel %vm701_vm4, %v702_v36, %v700_v62 }
 0x391   :  { %1190 = vpush %v703_v0 }
 0x3c2   :  { %s1191_s29 = spop %1190 }
 0x3c3   :  { %s705_s30 = smul.f32 0.4307273, %s1191_s29 }
 0x3c5   :  { %s706_s4 = ssub.f32 %s688_s28, %s705_s30 }
 0x3c6   :  { %s707_s5 = sadd.f32 %s705_s30, %s688_s28 }
 0x3c7   :  { %v708_v40 = vstv %s706_s4 }
 0x3c8   :  { %vm709_vm5 = vcmp.ge.f32.partialorder %v1750_v58, %v708_v40  ;;  %vm710_vm6 = vcmp.ge.f32.partialorder %v1752_v19, %v708_v40  ;;  %vm711_vm7 = vcmp.ge.f32.partialorder %v1754_v15, %v708_v40  ;;  %vm712_vm8 = vcmp.ge.f32.partialorder %v1756_v35, %v708_v40 }
 0x3c9   :  { %vm713_vm9 = vcmp.ge.f32.partialorder %v1762_v63, %v708_v40  ;;  %vm714_vm10 = vcmp.ge.f32.partialorder %v1766_v6, %v708_v40  ;;  %vm715_vm11 = vcmp.ge.f32.partialorder %v1770_v61, %v708_v40  ;;  %vm716_vm12 = vcmp.ge.f32.partialorder %v1774_v56, %v708_v40 }
 0x3ca   :  { %vm717_vm13 = vcmp.ge.f32.partialorder %v1778_v10, %v708_v40  ;;  %vm718_vm14 = vcmp.ge.f32.partialorder %v1782_v46, %v708_v40  ;;  %vm719_vm15 = vcmp.ge.f32.partialorder %v1786_v9, %v708_v40  ;;  %vm720_vm1 = vcmp.ge.f32.partialorder %v1790_v41, %v708_v40 }
 0x3cb   :  { %vm721_vm2 = vcmp.ge.f32.partialorder %v1794_v45, %v708_v40  ;;  %vm722_vm3 = vcmp.ge.f32.partialorder %v1798_v52, %v708_v40  ;;  %vm723_vm4 = vcmp.ge.f32.partialorder %v1802_v50, %v708_v40  ;;  %vm724_vm0 = vcmp.ge.f32.partialorder %v1806_v54, %v708_v40 }
 0x3cc   :  { %v1872_v29 = vstv %s707_s5  ;;  %v725_v12 = vsel %vm709_vm5, 1.0, %v1280_v39  ;;  %v726_v3 = vsel %vm710_vm6, 1.0, %v1280_v39  ;;  %v727_v4 = vsel %vm711_vm7, 1.0, %v1280_v39 }
 0x3cd   :  { %v728_v23 = vsel %vm712_vm8, 1.0, %v1280_v39  ;;  %v729_v18 = vsel %vm713_vm9, 1.0, %v1280_v39  ;;  %v730_v1 = vsel %vm714_vm10, 1.0, %v1280_v39  ;;  %v731_v21 = vsel %vm715_vm11, 1.0, %v1280_v39 }
 0x3ce   :  { %v732_v55 = vsel %vm716_vm12, 1.0, %v1280_v39  ;;  %v733_v42 = vsel %vm717_vm13, 1.0, %v1280_v39  ;;  %v734_v22 = vsel %vm718_vm14, 1.0, %v1280_v39  ;;  %vm742_vm5 = vcmp.ge.f32.partialorder %v1750_v58, %v1872_v29 }
 0x3cf   :  { %vm743_vm6 = vcmp.ge.f32.partialorder %v1752_v19, %v1872_v29  ;;  %v735_v27 = vsel %vm719_vm15, 1.0, %v1280_v39  ;;  %v736_v59 = vsel %vm720_vm1, 1.0, %v1280_v39  ;;  %vm744_vm7 = vcmp.ge.f32.partialorder %v1754_v15, %v1872_v29 }
 0x3d0   :  { %vm745_vm8 = vcmp.ge.f32.partialorder %v1756_v35, %v1872_v29  ;;  %v737_v11 = vsel %vm721_vm2, 1.0, %v1280_v39  ;;  %v738_v58 = vsel %vm722_vm3, 1.0, %v1280_v39  ;;  %v739_v19 = vsel %vm723_vm4, 1.0, %v1280_v39 }
 0x3d1   :  { %vm746_vm9 = vcmp.ge.f32.partialorder %v1762_v63, %v1872_v29  ;;  %v740_v49 = vsel %vm724_vm0, 1.0, %v1280_v39  ;;  %vm747_vm10 = vcmp.ge.f32.partialorder %v1766_v6, %v1872_v29  ;;  %v758_v15 = vsel %vm742_vm5, 1.0, %v1280_v39 }
 0x3d2   :  { %v759_v35 = vsel %vm743_vm6, 1.0, %v1280_v39  ;;  %vm748_vm11 = vcmp.ge.f32.partialorder %v1770_v61, %v1872_v29  ;;  %vm749_vm12 = vcmp.ge.f32.partialorder %v1774_v56, %v1872_v29  ;;  %v760_v5 = vsel %vm744_vm7, 1.0, %v1280_v39 }
 0x3d3   :  { %v761_v20 = vsel %vm745_vm8, 1.0, %v1280_v39  ;;  %vm750_vm13 = vcmp.ge.f32.partialorder %v1778_v10, %v1872_v29  ;;  %vm751_vm14 = vcmp.ge.f32.partialorder %v1782_v46, %v1872_v29  ;;  %vm752_vm0 = vcmp.ge.f32.partialorder %v1786_v9, %v1872_v29 }
 0x3d4   :  { %v762_v63 = vsel %vm746_vm9, 1.0, %v1280_v39  ;;  %vm753_vm15 = vcmp.ge.f32.partialorder %v1790_v41, %v1872_v29  ;;  %v763_v6 = vsel %vm747_vm10, 1.0, %v1280_v39  ;;  %v774_v61 = vadd.f32 %v758_v15, %v725_v12 }
 0x3d5   :  { %v775_v38 = vadd.f32 %v759_v35, %v726_v3  ;;  %vm754_vm1 = vcmp.ge.f32.partialorder %v1794_v45, %v1872_v29  ;;  %v764_v30 = vsel %vm748_vm11, 1.0, %v1280_v39  ;;  %v776_v28 = vadd.f32 %v760_v5, %v727_v4 }
 0x3d6   :  { %v777_v33 = vadd.f32 %v761_v20, %v728_v23  ;;  %vm755_vm2 = vcmp.ge.f32.partialorder %v1798_v52, %v1872_v29  ;;  %vm756_vm3 = vcmp.ge.f32.partialorder %v1802_v50, %v1872_v29  ;;  %v765_v32 = vsel %vm749_vm12, 1.0, %v1280_v39 }
 0x3d7   :  { %v778_v51 = vadd.f32 %v762_v63, %v729_v18  ;;  %vm757_vm4 = vcmp.ge.f32.partialorder %v1806_v54, %v1872_v29  ;;  %v766_v25 = vsel %vm750_vm13, 1.0, %v1280_v39  ;;  %v767_v16 = vsel %vm751_vm14, 1.0, %v1280_v39 }
 0x3d8   :  { %v779_v34 = vadd.f32 %v763_v6, %v730_v1  ;;  %v768_v26 = vsel %vm752_vm0, 1.0, %v1280_v39  ;;  %v780_v17 = vadd.f32 %v764_v30, %v731_v21  ;;  %v790_v56 = vmul.f32 0.33333334, %v774_v61 }
 0x3d9   :  { %v791_v24 = vmul.f32 0.33333334, %v775_v38  ;;  %v769_v44 = vsel %vm753_vm15, 1.0, %v1280_v39  ;;  %v781_v37 = vadd.f32 %v765_v32, %v732_v55  ;;  %v792_v47 = vmul.f32 0.33333334, %v776_v28 }
 0x3da   :  { %v793_v10 = vmul.f32 0.33333334, %v777_v33  ;;  %v770_v46 = vsel %vm754_vm1, 1.0, %v1280_v39  ;;  %v771_v13 = vsel %vm755_vm2, 1.0, %v1280_v39  ;;  %v782_v9 = vadd.f32 %v766_v25, %v733_v42 }
 0x3db   :  { %v794_v8 = vmul.f32 0.33333334, %v778_v51  ;;  %v772_v48 = vsel %vm756_vm3, 1.0, %v1280_v39  ;;  %v773_v41 = vsel %vm757_vm4, 1.0, %v1280_v39  ;;  %v783_v2 = vadd.f32 %v767_v16, %v734_v22 }
 0x3dc   :  { %v795_v43 = vmul.f32 0.33333334, %v779_v34  ;;  %v784_v53 = vadd.f32 %v768_v26, %v735_v27  ;;  %v796_v14 = vmul.f32 0.33333334, %v780_v17  ;;  %v808_v45 = vsub.f32 %v1855_v7, %v790_v56 }
 0x3dd   :  { %v809_v57 = vsub.f32 %v1855_v7, %v791_v24  ;;  %v785_v52 = vadd.f32 %v769_v44, %v736_v59  ;;  %v797_v60 = vmul.f32 0.33333334, %v781_v37  ;;  %v810_v31 = vsub.f32 %v1855_v7, %v792_v47 }
 0x3de   :  { %v811_v36 = vsub.f32 %v1855_v7, %v793_v10  ;;  %v786_v50 = vadd.f32 %v770_v46, %v737_v11  ;;  %v787_v62 = vadd.f32 %v771_v13, %v738_v58  ;;  %v798_v0 = vmul.f32 0.33333334, %v782_v9 }
 0x3df   :  { %v812_v54 = vsub.f32 %v1855_v7, %v794_v8  ;;  %v788_v40 = vadd.f32 %v772_v48, %v739_v19  ;;  %v789_v29 = vadd.f32 %v773_v41, %v740_v49  ;;  %v799_v39 = vmul.f32 0.33333334, %v783_v2 }
 0x3e0   :  { %v813_v12 = vsub.f32 %v1855_v7, %v795_v43  ;;  %v800_v3 = vmul.f32 0.33333334, %v784_v53  ;;  %v814_v4 = vsub.f32 %v1855_v7, %v796_v14  ;;  %v1164_v23 = vmul.f32 -50.0, %v808_v45 }
 0x3e1   :  { %v1165_v18 = vmul.f32 -50.0, %v809_v57  ;;  %v801_v1 = vmul.f32 0.33333334, %v785_v52  ;;  %v815_v21 = vsub.f32 %v1855_v7, %v797_v60  ;;  %v1166_v55 = vmul.f32 -50.0, %v810_v31 }
 0x3e2   :  { %v1167_v42 = vmul.f32 -50.0, %v811_v36  ;;  %v802_v22 = vmul.f32 0.33333334, %v786_v50  ;;  %v803_v27 = vmul.f32 0.33333334, %v787_v62  ;;  %v816_v59 = vsub.f32 %v1855_v7, %v798_v0 }
 0x3e3   :  { %v1168_v11 = vmul.f32 -50.0, %v812_v54  ;;  %v804_v58 = vmul.f32 0.33333334, %v788_v40  ;;  %v805_v19 = vmul.f32 0.33333334, %v789_v29  ;;  %v817_v49 = vsub.f32 %v1855_v7, %v799_v39 }
 0x3e4   :  { %v1169_v15 = vmul.f32 -50.0, %v813_v12  ;;  %v818_v35 = vsub.f32 %v1855_v7, %v800_v3  ;;  %v1170_v5 = vmul.f32 -50.0, %v814_v4  ;;  %v856_v20 = vmul.f32 1.442695, %v1164_v23 }
 0x3e5   :  { %v858_v63 = vmul.f32 1.442695, %v1165_v18  ;;  %v819_v6 = vsub.f32 %v1855_v7, %v801_v1  ;;  %v1171_v61 = vmul.f32 -50.0, %v815_v21  ;;  %v860_v38 = vmul.f32 1.442695, %v1166_v55 }
 0x3e6   :  { %v862_v30 = vmul.f32 1.442695, %v1167_v42  ;;  %v820_v28 = vsub.f32 %v1855_v7, %v802_v22  ;;  %v1172_v33 = vmul.f32 -50.0, %v816_v59  ;;  %1213 = vpow2.f32 %v856_v20 }
 0x3e7   :  { %v864_v32 = vmul.f32 1.442695, %v1168_v11  ;;  %v821_v51 = vsub.f32 %v1855_v7, %v803_v27  ;;  %v1173_v25 = vmul.f32 -50.0, %v817_v49  ;;  %1215 = vpow2.f32 %v858_v63 }
 0x3e8   :  { %v866_v16 = vmul.f32 1.442695, %v1169_v15  ;;  %v822_v34 = vsub.f32 %v1855_v7, %v804_v58  ;;  %v1174_v26 = vmul.f32 -50.0, %v818_v35  ;;  %1217 = vpow2.f32 %v860_v38 }
 0x3e9   :  { %v868_v17 = vmul.f32 1.442695, %v1170_v5  ;;  %v823_v56 = vsub.f32 %v1855_v7, %v805_v19  ;;  %v1175_v24 = vmul.f32 -50.0, %v819_v6  ;;  %1219 = vpow2.f32 %v862_v30 }
 0x3ea   :  { %v870_v44 = vmul.f32 1.442695, %v1171_v61  ;;  %v1176_v37 = vmul.f32 -50.0, %v820_v28  ;;  %1221 = vpow2.f32 %v864_v32  ;;  %v872_v47 = vmul.f32 1.442695, %v1172_v33 }
 0x3eb   :  { %v1177_v10 = vmul.f32 -50.0, %v821_v51  ;;  %1223 = vpow2.f32 %v866_v16  ;;  %v874_v46 = vmul.f32 1.442695, %v1173_v25  ;;  %v1178_v9 = vmul.f32 -50.0, %v822_v34 }
 0x3ec   :  { %v1214_v13 = vpop.eup %1213  ;;  %1225 = vpow2.f32 %v868_v17  ;;  %v876_v8 = vmul.f32 1.442695, %v1174_v26  ;;  %v1179_v41 = vmul.f32 -50.0, %v823_v56  ;;  %v878_v2 = vmul.f32 1.442695, %v1175_v24 }
 0x3ed   :  { %v1216_v48 = vpop.eup %1215  ;;  %1227 = vpow2.f32 %v870_v44  ;;  %v880_v7 = vmul.f32 1.442695, %v1176_v37  ;;  %v882_v14 = vmul.f32 1.442695, %v1177_v10  ;;  %v884_v57 = vmul.f32 1.442695, %v1178_v9 }
 0x3ee   :  { %v1218_v43 = vpop.eup %1217  ;;  %1229 = vpow2.f32 %v872_v47  ;;  %v886_v60 = vmul.f32 1.442695, %v1179_v41  ;;  %v1981_v31 = vadd.f32 1.0, %v1214_v13  ;;  %v1983_v50 = vadd.f32 1.0, %v1216_v48 }
 0x3ef   :  { %v1220_v53 = vpop.eup %1219  ;;  %1231 = vpow2.f32 %v874_v46  ;;  %v1985_v54 = vadd.f32 1.0, %v1218_v43 }
 0x3f0   :  { %v1222_v45 = vpop.eup %1221  ;;  %1233 = vpow2.f32 %v876_v8  ;;  %v1987_v40 = vadd.f32 1.0, %v1220_v53  ;;  %v915_v39 = vand.u32 2147483648, %v1981_v31  ;;  %v930_v4 = vand.u32 2147483648, %v1983_v50 }
 0x3f1   :  { %v1224_v52 = vpop.eup %1223  ;;  %1235 = vpow2.f32 %v878_v2  ;;  %v1990_v3 = vadd.f32 1.0, %v1222_v45  ;;  %v913_v1 = vand.u32 2147483647, %v1981_v31  ;;  %v945_v42 = vand.u32 2147483648, %v1985_v54 }
 0x3f2   :  { %v1226_v36 = vpop.eup %1225  ;;  %1237 = vpow2.f32 %v880_v7  ;;  %v1996_v18 = vadd.f32 1.0, %v1224_v52  ;;  %v960_v22 = vand.u32 2147483648, %v1987_v40  ;;  %v2011_v11 = vor.u32 1.1754944e-38, %v915_v39 }
 0x3f3   :  { %v1228_v62 = vpop.eup %1227  ;;  %1239 = vpow2.f32 %v882_v14  ;;  %v2002_v55 = vadd.f32 1.0, %v1226_v36  ;;  %v928_v58 = vand.u32 2147483647, %v1983_v50  ;;  %v2017_v49 = vor.u32 1.1754944e-38, %v930_v4 }
 0x3f4   :  { %v1230_v0 = vpop.eup %1229  ;;  %1241 = vpow2.f32 %v884_v57  ;;  %v2009_v59 = vadd.f32 1.0, %v1228_v62  ;;  %v943_v15 = vand.u32 2147483647, %v1985_v54  ;;  %v975_v35 = vand.u32 2147483648, %v1990_v3 }
 0x3f5   :  { %v1232_v29 = vpop.eup %1231  ;;  %1243 = vpow2.f32 %v886_v60  ;;  %v2024_v20 = vadd.f32 1.0, %v1230_v0  ;;  %vm909_vm5 = vweird.f32 %v1981_v31  ;;  %v958_v6 = vand.u32 2147483647, %v1987_v40 }
 0x3f6   :  { %v1234_v12 = vpop.eup %1233  ;;  %1245 = vrcp.f32 %v1981_v31  ;;  %v2026_v63 = vadd.f32 1.0, %v1232_v29  ;;  %vm924_vm6 = vweird.f32 %v1983_v50  ;;  %v2036_v30 = vor.u32 1.1754944e-38, %v945_v42 }
 0x3f7   :  { %v1994_v23 = vpop.eup %1235  ;;  %1247 = vrcp.f32 %v1983_v50  ;;  %v2033_v38 = vadd.f32 1.0, %v1234_v12  ;;  %v2038_v28 = vor.u32 1.1754944e-38, %v960_v22  ;;  %vm2043_vm7 = vcmp.eq.f32.partialorder %v913_v1, 8.507059e+37 }
 0x3f8   :  { %v2000_v21 = vpop.eup %1237  ;;  %1249 = vrcp.f32 %v1985_v54  ;;  %vm939_vm8 = vweird.f32 %v1985_v54  ;;  %v973_v25 = vand.u32 2147483647, %v1990_v3  ;;  %v2049_v16 = vor.u32 1.1754944e-38, %v975_v35 }
 0x3f9   :  { %v2007_v27 = vpop.eup %1239  ;;  %1251 = vrcp.f32 %v1987_v40  ;;  %v988_v34 = vand.u32 2147483647, %v1996_v18  ;;  %vm2054_vm11 = vcmp.eq.f32.partialorder %v928_v58, 8.507059e+37  ;;  %vm954_vm12 = vweird.f32 %v1987_v40 }
 0x3fa   :  { %v2015_v19 = vpop.eup %1241  ;;  %1253 = vrcp.f32 %v1990_v3  ;;  %v990_v24 = vand.u32 2147483648, %v1996_v18  ;;  %vm2061_vm14 = vcmp.eq.f32.partialorder %v943_v15, 8.507059e+37  ;;  %v1003_v46 = vand.u32 2147483647, %v2002_v55 }
 0x3fb   :  { %v2022_v5 = vpop.eup %1243  ;;  %1255 = vrcp.f32 %v1996_v18  ;;  %vm2068_vm1 = vcmp.eq.f32.partialorder %v958_v6, 8.507059e+37  ;;  %v1005_v41 = vand.u32 2147483648, %v2002_v55  ;;  %vm2076_vm4 = vcmp.eq.f32.partialorder %v973_v25, 8.507059e+37 }
 0x3fc   :  { %v2031_v61 = vpop.eup %1245  ;;  %1257 = vrcp.f32 %v2002_v55  ;;  %v2174_v10 = vadd.f32 1.0, %v2022_v5  ;;  %v1063_v5 = vand.u32 2147483647, %v2033_v38  ;;  %v1065_v48 = vand.u32 2147483648, %v2033_v38 }
 0x3fd   :  { %v1248_v33 = vpop.eup %1247  ;;  %v905_v32 = vmul.f32 %v2031_v61, %v1981_v31  ;;  %vm910_vm9 = vweird.f32 %v2031_v61  ;;  %1259 = vrcp.f32 %v2009_v59 }
 0x3fe   :  { %v1250_v26 = vpop.eup %1249  ;;  %v920_v17 = vmul.f32 %v1248_v33, %v1983_v50  ;;  %vm925_vm10 = vweird.f32 %v1248_v33  ;;  %vm911_vm3 = vmor %vm909_vm5, %vm910_vm9  ;;  %vm2303_vm9 = vcmask 7168   ;;  %1261 = vrcp.f32 %v2024_v20 }
 0x3ff   :  { %v1252_v44 = vpop.eup %1251  ;;  %v906_v37 = vsub.f32 1.0, %v905_v32  ;;  %v935_v47 = vmul.f32 %v1250_v26, %v1985_v54  ;;  %vm940_vm13 = vweird.f32 %v1250_v26  ;;  %vm926_vm2 = vmor %vm924_vm6, %vm925_vm10  ;;  %1263 = vrcp.f32 %v2026_v63 }
 0x400   :  { %v1254_v13 = vpop.eup %1253  ;;  %v921_v9 = vsub.f32 1.0, %v920_v17  ;;  %v950_v8 = vmul.f32 %v1252_v44, %v1987_v40  ;;  %vm955_vm15 = vweird.f32 %v1252_v44  ;;  %vm941_vm5 = vmor %vm939_vm8, %vm940_vm13  ;;  %vm2305_vm8 = vweird.f32 %v1990_v3 }
 0x401   :  { %v1256_v2 = vpop.eup %1255  ;;  %v907_v43 = vmul.f32 %v2031_v61, %v906_v37  ;;  %v936_v7 = vsub.f32 1.0, %v935_v47  ;;  %v965_v53 = vmul.f32 %v1254_v13, %v1990_v3  ;;  %vm956_vm6 = vmor %vm954_vm12, %vm955_vm15  ;;  %vm2308_vm13 = vweird.f32 %v1996_v18 }
 0x402   :  { %v1258_v45 = vpop.eup %1257  ;;  %v922_v57 = vmul.f32 %v1248_v33, %v921_v9  ;;  %v951_v52 = vsub.f32 1.0, %v950_v8  ;;  %v980_v60 = vmul.f32 %v1256_v2, %v1996_v18  ;;  %vm2307_vm12 = vweird.f32 %v1256_v2  ;;  %vm2309_vm15 = vmmov %vm2303_vm9 }
 0x403   :  { %v908_v36 = vadd.f32 %v2031_v61, %v907_v43  ;;  %v937_v62 = vmul.f32 %v1250_v26, %v936_v7  ;;  %v966_v0 = vsub.f32 1.0, %v965_v53  ;;  %v995_v29 = vmul.f32 %v1258_v45, %v2002_v55  ;;  %v1260_v47 = vpop.eup %1259 }
 0x404   :  { %v923_v39 = vadd.f32 %v1248_v33, %v922_v57  ;;  %v952_v12 = vmul.f32 %v1252_v44, %v951_v52  ;;  %v981_v4 = vsub.f32 1.0, %v980_v60  ;;  %vm1000_vm0 = vweird.f32 %v1258_v45 }
 0x405   :  { %v912_v1 = vsel %vm911_vm3, %v2031_v61, %v908_v36  ;;  %v938_v42 = vadd.f32 %v1250_v26, %v937_v62  ;;  %v967_v22 = vmul.f32 %v1254_v13, %v966_v0  ;;  %v996_v58 = vsub.f32 1.0, %v995_v29 }
 0x406   :  { %v917_v15 = vsel %vm2043_vm7, %v2011_v11, %v912_v1  ;;  %v927_v35 = vsel %vm926_vm2, %v1248_v33, %v923_v39  ;;  %v953_v31 = vadd.f32 %v1252_v44, %v952_v12  ;;  %v982_v6 = vmul.f32 %v1256_v2, %v981_v4 }
 0x407   :  { %v932_v61 = vsel %vm2054_vm11, %v2017_v49, %v927_v35  ;;  %v942_v50 = vsel %vm941_vm5, %v1250_v26, %v938_v42  ;;  %v968_v32 = vadd.f32 %v1254_v13, %v967_v22  ;;  %v997_v25 = vmul.f32 %v1258_v45, %v996_v58  ;;  %1144 = vst.msk [vmem:[%s2291_s3] sm:$0xff] %vm2303_vm9, %v917_v15  ;;  %vm2306_vm11 = vmmov %vm2303_vm9 }
 0x408   :  { %v947_v54 = vsel %vm2061_vm14, %v2036_v30, %v942_v50  ;;  %v957_v11 = vsel %vm956_vm6, %v1252_v44, %v953_v31  ;;  %vm2304_vm7 = vweird.f32 %v1254_v13  ;;  %v983_v49 = vadd.f32 %v1256_v2, %v982_v6  ;;  %1145 = vst.msk [vmem:[%s2291_s3 + $0x8] sm:$0xff] %vm2306_vm11, %v932_v61  ;;  %vm986_vm14 = vmor %vm2308_vm13, %vm2307_vm12 }
 0x409   :  { %vm971_vm10 = vmor %vm2305_vm8, %vm2304_vm7  ;;  %v991_v33 = vor.u32 1.1754944e-38, %v990_v24  ;;  %v962_v40 = vsel %vm2068_vm1, %v2038_v28, %v957_v11  ;;  %v998_v30 = vadd.f32 %v1258_v45, %v997_v25  ;;  %1146 = vst.msk [vmem:[%s2291_s3 + $0x10] sm:$0xff] %vm2309_vm15, %v947_v54  ;;  %vm989_vm1 = vcmp.eq.f32.partialorder %v988_v34, 8.507059e+37 }
 0x40a   :  { %v972_v51 = vsel %vm971_vm10, %v1254_v13, %v968_v32  ;;  %v987_v26 = vsel %vm986_vm14, %v1256_v2, %v983_v49  ;;  %vm2310_vm2 = vweird.f32 %v2002_v55  ;;  %v1006_v28 = vor.u32 1.1754944e-38, %v1005_v41  ;;  %vm2311_vm5 = vmmov %vm2303_vm9 }
 0x40b   :  { %v977_v3 = vsel %vm2076_vm4, %v2049_v16, %v972_v51  ;;  %vm1001_vm3 = vmor %vm2310_vm2, %vm1000_vm0  ;;  %1147 = vst.msk [vmem:[%s2291_s3 + $0x18] sm:$0xff] %vm2311_vm5, %v962_v40  ;;  %v992_v17 = vsel %vm989_vm1, %v991_v33, %v987_v26  ;;  %vm1004_vm6 = vcmp.eq.f32.partialorder %v1003_v46, 8.507059e+37  ;;  %v1018_v16 = vand.u32 2147483647, %v2009_v59 }
 0x40c   :  { %v1002_v56 = vsel %vm1001_vm3, %v1258_v45, %v998_v30  ;;  %vm2312_vm4 = vmmov %vm2311_vm5  ;;  %v1020_v34 = vand.u32 2147483648, %v2009_v59  ;;  %v2155_v55 = vadd.f32 1.0, %v1994_v23  ;;  %v2163_v24 = vadd.f32 1.0, %v2000_v21 }
 0x40d   :  { %1148 = vst.msk [vmem:[%s2291_s3 + $0x20] sm:$0xff] %vm2312_vm4, %v977_v3  ;;  %v1007_v18 = vsel %vm1004_vm6, %v1006_v28, %v1002_v56  ;;  %vm2313_vm0 = vmmov %vm2312_vm4  ;;  %v2166_v44 = vadd.f32 1.0, %v2007_v27  ;;  %v1033_v37 = vand.u32 2147483647, %v2024_v20  ;;  %1265 = vrcp.f32 %v2033_v38 }
 0x40e   :  { %1149 = vst.msk [vmem:[%s2291_s3 + $0x28] sm:$0xff] %vm2313_vm0, %v992_v17  ;;  %vm2314_vm9 = vmmov %vm2313_vm0  ;;  %v2171_v23 = vadd.f32 1.0, %v2015_v19  ;;  %vm1014_vm7 = vweird.f32 %v2009_v59  ;;  %v1035_v46 = vand.u32 2147483648, %v2024_v20  ;;  %v1010_v21 = vmul.f32 %v1260_v47, %v2009_v59  ;;  %v1262_v19 = vpop.eup %1261 }
 0x40f   :  { %1150 = vst.msk [vmem:[%s2291_s3 + $0x30] sm:$0xff] %vm2314_vm9, %v1007_v18  ;;  %vm2179_vm8 = vcmp.eq.f32.partialorder %v1018_v16, 8.507059e+37  ;;  %v1021_v13 = vor.u32 1.1754944e-38, %v1020_v34  ;;  %vm1029_vm10 = vweird.f32 %v2024_v20  ;;  %v1048_v9 = vand.u32 2147483647, %v2026_v63  ;;  %v1264_v7 = vpop.eup %1263 }
 0x410   :  { %v1050_v8 = vand.u32 2147483648, %v2026_v63  ;;  %1267 = vrcp.f32 %v2155_v55  ;;  %v1011_v41 = vsub.f32 1.0, %v1010_v21  ;;  %v1025_v2 = vmul.f32 %v1262_v19, %v2024_v20 }
 0x411   :  { %vm2190_vm11 = vcmp.eq.f32.partialorder %v1033_v37, 8.507059e+37  ;;  %vm1044_vm12 = vweird.f32 %v2026_v63  ;;  %vm1015_vm13 = vweird.f32 %v1260_v47  ;;  %v1036_v53 = vor.u32 1.1754944e-38, %v1035_v46 }
 0x412   :  { %vm1059_vm14 = vweird.f32 %v2033_v38  ;;  %1269 = vrcp.f32 %v2163_v24  ;;  %v1012_v45 = vmul.f32 %v1260_v47, %v1011_v41  ;;  %v1026_v57 = vsub.f32 1.0, %v1025_v2  ;;  %vm1016_vm5 = vmor %vm1014_vm7, %vm1015_vm13 }
 0x413   :  { %v1266_v14 = vpop.eup %1265  ;;  %v1040_v52 = vmul.f32 %v1264_v7, %v2026_v63  ;;  %vm2198_vm15 = vcmp.eq.f32.partialorder %v1048_v9, 8.507059e+37  ;;  %v1051_v36 = vor.u32 1.1754944e-38, %v1050_v8  ;;  %vm2203_vm1 = vcmp.eq.f32.partialorder %v1063_v5, 8.507059e+37  ;;  %vm2323_vm13 = vmmov %vm2314_vm9 }
 0x414   :  { %v1055_v62 = vmul.f32 %v1266_v14, %v2033_v38  ;;  %v1066_v29 = vor.u32 1.1754944e-38, %v1065_v48  ;;  %v1013_v39 = vadd.f32 %v1260_v47, %v1012_v45  ;;  %v1027_v12 = vmul.f32 %v1262_v19, %v1026_v57 }
 0x415   :  { %vm1030_vm2 = vweird.f32 %v1262_v19  ;;  %v1041_v4 = vsub.f32 1.0, %v1040_v52  ;;  %vm1074_vm3 = vweird.f32 %v2155_v55  ;;  %vm1045_vm6 = vweird.f32 %v1264_v7 }
 0x416   :  { %v1268_v1 = vpop.eup %1267  ;;  %v1056_v42 = vsub.f32 1.0, %v1055_v62  ;;  %v1078_v22 = vand.u32 2147483647, %v2155_v55  ;;  %1271 = vrcp.f32 %v2166_v44  ;;  %v1017_v58 = vsel %vm1016_vm5, %v1260_v47, %v1013_v39  ;;  %vm1031_vm4 = vmor %vm1029_vm10, %vm1030_vm2 }
 0x417   :  { %v1028_v15 = vadd.f32 %v1262_v19, %v1027_v12  ;;  %v1042_v35 = vmul.f32 %v1264_v7, %v1041_v4  ;;  %v1070_v31 = vmul.f32 %v1268_v1, %v2155_v55  ;;  %v1022_v61 = vsel %vm2179_vm8, %v1021_v13, %v1017_v58  ;;  %vm1046_vm7 = vmor %vm1044_vm12, %vm1045_vm6 }
 0x418   :  { %v1270_v6 = vpop.eup %1269  ;;  %v1057_v59 = vmul.f32 %v1266_v14, %v1056_v42  ;;  %vm1060_vm0 = vweird.f32 %v1266_v14  ;;  %v1080_v50 = vand.u32 2147483648, %v2155_v55  ;;  %1151 = vst.msk [vmem:[%s2291_s3 + $0x38] sm:$0xff] %vm2314_vm9, %v1022_v61  ;;  %v1093_v33 = vand.u32 2147483647, %v2163_v24  ;;  %vm2324_vm12 = vmmov %vm2314_vm9 }
 0x419   :  { %v1032_v32 = vsel %vm1031_vm4, %v1262_v19, %v1028_v15  ;;  %v1043_v25 = vadd.f32 %v1264_v7, %v1042_v35  ;;  %v1071_v54 = vsub.f32 1.0, %v1070_v31  ;;  %v1085_v11 = vmul.f32 %v1270_v6, %v2163_v24  ;;  %vm1061_vm8 = vmor %vm1059_vm14, %vm1060_vm0 }
 0x41a   :  { %v1037_v49 = vsel %vm2190_vm11, %v1036_v53, %v1032_v32  ;;  %v1058_v20 = vadd.f32 %v1266_v14, %v1057_v59  ;;  %v1095_v40 = vand.u32 2147483648, %v2163_v24  ;;  %vm1075_vm10 = vweird.f32 %v1268_v1  ;;  %vm2325_vm5 = vmmov %vm2314_vm9 }
 0x41b   :  { %v1047_v51 = vsel %vm1046_vm7, %v1264_v7, %v1043_v25  ;;  %v1072_v30 = vmul.f32 %v1268_v1, %v1071_v54  ;;  %v1086_v3 = vsub.f32 1.0, %v1085_v11  ;;  %1152 = vst.msk [vmem:[%s2291_s3 + $0x40] sm:$0xff] %vm2323_vm13, %v1037_v49  ;;  %vm1090_vm11 = vweird.f32 %v1270_v6  ;;  %vm1076_vm14 = vmor %vm1074_vm3, %vm1075_vm10 }
 0x41c   :  { %v1272_v26 = vpop.eup %1271  ;;  %v1052_v63 = vsel %vm2198_vm15, %v1051_v36, %v1047_v51  ;;  %v1062_v28 = vsel %vm1061_vm8, %v1266_v14, %v1058_v20  ;;  %1273 = vrcp.f32 %v2171_v23  ;;  %vm1079_vm15 = vcmp.eq.f32.partialorder %v1078_v22, 8.507059e+37  ;;  %vm2326_vm4 = vmmov %vm2325_vm5 }
 0x41d   :  { %v1067_v38 = vsel %vm2203_vm1, %v1066_v29, %v1062_v28  ;;  %v1073_v17 = vadd.f32 %v1268_v1, %v1072_v30  ;;  %v1087_v56 = vmul.f32 %v1270_v6, %v1086_v3  ;;  %v1100_v18 = vmul.f32 %v1272_v26, %v2166_v44  ;;  %1153 = vst.msk [vmem:[%s2291_s3 + $0x48] sm:$0xff] %vm2324_vm12, %v1052_v63  ;;  %vm2327_vm9 = vmmov %vm2326_vm4 }
 0x41e   :  { %v1081_v16 = vor.u32 1.1754944e-38, %v1080_v50  ;;  %vm1089_vm2 = vweird.f32 %v2163_v24  ;;  %1154 = vst.msk [vmem:[%s2291_s3 + $0x50] sm:$0xff] %vm2325_vm5, %v1067_v38  ;;  %vm1094_vm1 = vcmp.eq.f32.partialorder %v1093_v33, 8.507059e+37  ;;  %v1096_v21 = vor.u32 1.1754944e-38, %v1095_v40  ;;  %vm2328_vm13 = vmmov %vm2326_vm4 }
 0x41f   :  { %v1077_v34 = vsel %vm1076_vm14, %v1268_v1, %v1073_v17  ;;  %v1088_v37 = vadd.f32 %v1270_v6, %v1087_v56  ;;  %v1101_v47 = vsub.f32 1.0, %v1100_v18  ;;  %vm1091_vm6 = vmor %vm1089_vm2, %vm1090_vm11  ;;  %v1110_v55 = vand.u32 2147483648, %v2166_v44 }
 0x420   :  { %v1082_v46 = vsel %vm1079_vm15, %v1081_v16, %v1077_v34  ;;  %1275 = vrcp.f32 %v2174_v10  ;;  %vm1105_vm3 = vweird.f32 %v1272_v26  ;;  %v1108_v24 = vand.u32 2147483647, %v2166_v44  ;;  %vm2329_vm5 = vmmov %vm2326_vm4 }
 0x421   :  { %v1092_v27 = vsel %vm1091_vm6, %v1270_v6, %v1088_v37  ;;  %v1102_v13 = vmul.f32 %v1272_v26, %v1101_v47  ;;  %1155 = vst.msk [vmem:[%s2291_s3 + $0x58] sm:$0xff] %vm2326_vm4, %v1082_v46  ;;  %vm1104_vm0 = vweird.f32 %v2166_v44  ;;  %v1111_v48 = vor.u32 1.1754944e-38, %v1110_v55 }
 0x422   :  { %v1274_v9 = vpop.eup %1273  ;;  %v1097_v19 = vsel %vm1094_vm1, %v1096_v21, %v1092_v27  ;;  %vm1106_vm7 = vmor %vm1104_vm0, %vm1105_vm3  ;;  %vm1109_vm8 = vcmp.eq.f32.partialorder %v1108_v24, 8.507059e+37  ;;  %v1123_v53 = vand.u32 2147483647, %v2171_v23  ;;  %v1125_v14 = vand.u32 2147483648, %v2171_v23 }
 0x423   :  { %v1103_v8 = vadd.f32 %v1272_v26, %v1102_v13  ;;  %v1115_v5 = vmul.f32 %v1274_v9, %v2171_v23  ;;  %1156 = vst.msk [vmem:[%s2291_s3 + $0x60] sm:$0xff] %vm2327_vm9, %v1097_v19  ;;  %vm1120_vm10 = vweird.f32 %v1274_v9  ;;  %vm1119_vm11 = vweird.f32 %v2171_v23  ;;  %vm2330_vm3 = vmmov %vm2326_vm4 }
 0x424   :  { %vm1121_vm12 = vmor %vm1119_vm11, %vm1120_vm10  ;;  %vm1124_vm14 = vcmp.eq.f32.partialorder %v1123_v53, 8.507059e+37  ;;  %v1126_v60 = vor.u32 1.1754944e-38, %v1125_v14  ;;  %v1140_v36 = vand.u32 2147483648, %v2174_v10  ;;  %v1138_v29 = vand.u32 2147483647, %v2174_v10 }
 0x425   :  { %v1107_v41 = vsel %vm1106_vm7, %v1272_v26, %v1103_v8  ;;  %v1116_v2 = vsub.f32 1.0, %v1115_v5  ;;  %vm1134_vm2 = vweird.f32 %v2174_v10 }
 0x426   :  { %v1276_v43 = vpop.eup %1275  ;;  %v1112_v7 = vsel %vm1109_vm8, %v1111_v48, %v1107_v41  ;;  %v1141_v23 = vor.u32 1.1754944e-38, %v1140_v36  ;;  %vm1139_vm6 = vcmp.eq.f32.partialorder %v1138_v29, 8.507059e+37 }
 0x427   :  { %v1117_v45 = vmul.f32 %v1274_v9, %v1116_v2  ;;  %v1130_v44 = vmul.f32 %v1276_v43, %v2174_v10  ;;  %1157 = vst.msk [vmem:[%s2291_s3 + $0x68] sm:$0xff] %vm2328_vm13, %v1112_v7  ;;  %vm1135_vm15 = vweird.f32 %v1276_v43 }
 0x428   :  { %vm1136_vm1 = vmor %vm1134_vm2, %vm1135_vm15 }
 0x429   :  { %v1118_v57 = vadd.f32 %v1274_v9, %v1117_v45  ;;  %v1131_v52 = vsub.f32 1.0, %v1130_v44 }
 0x42b   :  { %v1122_v62 = vsel %vm1121_vm12, %v1274_v9, %v1118_v57  ;;  %v1132_v0 = vmul.f32 %v1276_v43, %v1131_v52 }
 0x42c   :  { %v1127_v39 = vsel %vm1124_vm14, %v1126_v60, %v1122_v62 }
 0x42d   :  { %v1133_v12 = vadd.f32 %v1276_v43, %v1132_v0  ;;  %1158 = vst.msk [vmem:[%s2291_s3 + $0x70] sm:$0xff] %vm2329_vm5, %v1127_v39 }
 0x42f   :  { %v1137_v4 = vsel %vm1136_vm1, %v1276_v43, %v1133_v12 }
 0x430   :  { %v1142_v1 = vsel %vm1139_vm6, %v1141_v23, %v1137_v4 }
 0x431   :  { %1159 = vst.msk [vmem:[%s2291_s3 + $0x78] sm:$0xff] %vm2330_vm3, %v1142_v1 }

</bundles_post_ra>
